<compile_context>
chip_gen: v6e
topology: v6e:2x2x1
jax: 0.10.0
libtpu: 0.0.40
codegen_flags: <defaults>
</compile_context>

<pallas_src>
import functools

import jax
import jax.numpy as jnp
from jax import lax
from jax.experimental import pallas as pl
from jax.experimental.pallas import tpu as pltpu


OC_TOT = 5  # 1 (cls) + 4 (loc) fused output channels


# -----------------------------------------------------------------------------
# Fused kernel: one grid step == one batch element.
#   zp_ref : (72, KK)        im2col(T) of cropped template z       (KK = Hk*Wk)
#   xp_ref : (72, NS)        im2col(T) of search image x           (NS = Hs*Ws)
#   wk_ref : (5F, 72)        kernel-conv weights (adjust folded), row = c*5 + o
#   ws_ref : (2F, 72)        search-conv weights, rows = [cls F | loc F]
#   bk_ref : (5F, 1)         kernel-conv bias (adjust folded)
#   bs_ref : (2F, 1)         search-conv bias
#   ab_ref : (4, 1)          adjust bias (loc only)
#   q_ref  : (KK*F, KK*F)    constant permutation  Q[c*KK+s, s*F+c] = 1
#   o_ref  : (5, NS)         fused output rows: 0 = cls, 1..4 = loc
# -----------------------------------------------------------------------------
def _fused_kernel(zp_ref, xp_ref, wk_ref, ws_ref, bk_ref, bs_ref, ab_ref, q_ref,
                  o_ref, sf_ref, pat_ref, kc_ref, *,
                  feat, hk, wk, w_search, n_search):
    kk = hk * wk
    pad = (hk - 1) * w_search + (wk - 1)

    # --- search-branch conv for both heads: (2F,72) @ (72,NS) + bias (once) ---
    sf = jnp.dot(ws_ref[...], xp_ref[...],
                 preferred_element_type=jnp.float32) + bs_ref[...]
    sf_ref[:, :n_search] = sf
    sf_ref[:, n_search:] = jnp.zeros((2 * feat, pad), jnp.float32)

    # --- kernel-branch conv (adjust pre-folded): (5F,72) @ (72,KK) + bias -----
    kf = jnp.dot(wk_ref[...], zp_ref[...],
                 preferred_element_type=jnp.float32) + bk_ref[...]

    # --- re-layout kf (rows m=c*5+o, cols s) into kern_t[o, s*F+c] ------------
    # contiguous block copies + one constant permutation matmul (no reshapes)
    for c in range(feat):
        kc_ref[:, c * kk:(c + 1) * kk] = kf[c * OC_TOT:(c + 1) * OC_TOT, :]
    kern_t = jnp.dot(kc_ref[...], q_ref[...],
                     preferred_element_type=jnp.float32)        # (5, KK*F)

    # --- build shifted-window patches for both heads (rows = s*F + c) --------
    half = kk * feat
    for s in range(kk):
        off = (s // wk) * w_search + (s % wk)
        win = sf_ref[:, off:off + n_search]                      # (2F, NS)
        pat_ref[s * feat:(s + 1) * feat, :] = win[0:feat, :]             # cls
        pat_ref[half + s * feat: half + (s + 1) * feat, :] = win[feat:, :]  # loc

    # --- up-channel xcorr: two lane-dense matmuls, contraction = KK*F --------
    cls_out = jnp.dot(kern_t[0:1, :], pat_ref[0:half, :],
                      preferred_element_type=jnp.float32)
    loc_out = jnp.dot(kern_t[1:OC_TOT, :], pat_ref[half:2 * half, :],
                      preferred_element_type=jnp.float32) + ab_ref[...]
    o_ref[0:1, :] = cls_out.astype(o_ref.dtype)
    o_ref[1:OC_TOT, :] = loc_out.astype(o_ref.dtype)


def fused_upchannel(zp, xp, wk_all, ws_all, bk_all, bs_all, ab, q, *,
                    feat, hk, wk, w_search, n_search):
    B = zp.shape[0]
    kk = hk * wk
    kdim = ws_all.shape[1]                     # 3*3*Cin
    pad = (hk - 1) * w_search + (wk - 1)
    kernel_fn = functools.partial(_fused_kernel, feat=feat, hk=hk, wk=wk,
                                  w_search=w_search, n_search=n_search)
    return pl.pallas_call(
        kernel_fn,
        grid=(B,),
        in_specs=[
            pl.BlockSpec((None, kdim, kk), lambda b: (b, 0, 0)),
            pl.BlockSpec((None, kdim, n_search), lambda b: (b, 0, 0)),
            pl.BlockSpec((OC_TOT * feat, kdim), lambda b: (0, 0)),
            pl.BlockSpec((2 * feat, kdim), lambda b: (0, 0)),
            pl.BlockSpec((OC_TOT * feat, 1), lambda b: (0, 0)),
            pl.BlockSpec((2 * feat, 1), lambda b: (0, 0)),
            pl.BlockSpec((4, 1), lambda b: (0, 0)),
            pl.BlockSpec((kk * feat, kk * feat), lambda b: (0, 0)),
        ],
        out_specs=pl.BlockSpec((None, OC_TOT, n_search), lambda b: (b, 0, 0)),
        out_shape=jax.ShapeDtypeStruct((B, OC_TOT, n_search), xp.dtype),
        scratch_shapes=[
            pltpu.VMEM((2 * feat, n_search + pad), jnp.float32),   # search feats
            pltpu.VMEM((2 * kk * feat, n_search), jnp.float32),    # xcorr patches
            pltpu.VMEM((OC_TOT, kk * feat), jnp.float32),          # kern (c-major)
        ],
        compiler_params=pltpu.CompilerParams(dimension_semantics=("parallel",)),
    )(zp, xp, wk_all, ws_all, bk_all, bs_all, ab, q)


# -----------------------------------------------------------------------------
# Wrapper-side layout plumbing (pure XLA, done once per call).
# -----------------------------------------------------------------------------
def _im2col_T(x, kh, kw):
    """x: (B,C,H,W) -> (B, kh*kw*C, Ho*Wo); row = (p*kw+q)*C+ci, col = i*Wo+j."""
    B, C, H, W = x.shape
    ho, wo = H - kh + 1, W - kw + 1
    cols = [x[:, :, p:p + ho, q:q + wo] for p in range(kh) for q in range(kw)]
    pat = jnp.stack(cols, axis=1)                      # (B, kh*kw, C, ho, wo)
    return pat.reshape(B, kh * kw * C, ho * wo)


def _conv_w_to_mat(w):
    """(O,I,KH,KW) -> (O, KH*KW*I); col = (kh*KW+kw)*I + ci."""
    O, I, KH, KW = w.shape
    return jnp.transpose(w, (0, 2, 3, 1)).reshape(O, KH * KW * I)


def _prepare_weights(params, feat):
    cls_p, loc_p = params["cls"], params["loc"]

    ws_all = jnp.concatenate([_conv_w_to_mat(cls_p["search_w"]),
                              _conv_w_to_mat(loc_p["search_w"])], axis=0)
    bs_all = jnp.concatenate([cls_p["search_b"], loc_p["search_b"]])[:, None]

    # fold the 1x1 adjust (linear) into the loc kernel-conv weights/bias
    A = loc_p["adjust_w"][:, :, 0, 0]                          # (4,4) [o_out,o_in]
    mat_c = _conv_w_to_mat(cls_p["kernel_w"])                  # (F, 72)
    mat_l = _conv_w_to_mat(loc_p["kernel_w"]).reshape(4, feat, -1)   # [o, c, k]
    mat_l = jnp.einsum("po,ock->pck", A, mat_l)                # adjusted [o', c, k]
    wk_all = jnp.concatenate([mat_c[:, None, :],
                              jnp.transpose(mat_l, (1, 0, 2))], axis=1)
    wk_all = wk_all.reshape(feat * OC_TOT, -1)                 # row = c*5 + o

    bk_l = jnp.einsum("po,oc->pc", A, loc_p["kernel_b"].reshape(4, feat))
    bk_all = jnp.concatenate([cls_p["kernel_b"][:, None], bk_l.T],
                             axis=1).reshape(feat * OC_TOT, 1)

    ab = loc_p["adjust_b"][:, None]                            # (4,1)
    return ws_all, bs_all, wk_all, bk_all, ab


def _make_perm(kk, feat):
    c = jnp.arange(feat)
    s = jnp.arange(kk)
    rows = (c[:, None] * kk + s[None, :]).reshape(-1)
    cols = (s[None, :] * feat + c[:, None]).reshape(-1)
    return jnp.zeros((kk * feat, kk * feat), jnp.float32).at[rows, cols].set(1.0)


def up_channel_siamese_forward(params, z_f, x_f, feat_out):
    """z_f, x_f in NCHW (PyTorch convention); returns (loc, cls) in NCHW."""
    B = z_f.shape[0]
    z_c = z_f[:, :, 4:-4, 4:-4]
    hk, wk = z_c.shape[2] - 2, z_c.shape[3] - 2        # kernel_feat spatial (4,4)
    hs, ws = x_f.shape[2] - 2, x_f.shape[3] - 2        # search_feat spatial (14,14)
    ho, wo = hs - hk + 1, ws - wk + 1                  # xcorr output (11,11)

    zp = _im2col_T(z_c, 3, 3)                          # (B, 72, 16)
    xp = _im2col_T(x_f, 3, 3)                          # (B, 72, 196)
    ws_all, bs_all, wk_all, bk_all, ab = _prepare_weights(params, feat_out)
    q = _make_perm(hk * wk, feat_out)

    out = fused_upchannel(zp, xp, wk_all, ws_all, bk_all, bs_all, ab, q,
                          feat=feat_out, hk=hk, wk=wk,
                          w_search=ws, n_search=hs * ws)
    out = out.reshape(B, OC_TOT, hs, ws)[:, :, :ho, :wo]
    return out[:, 1:OC_TOT], out[:, 0:1]               # (loc, cls)


# -----------------------------------------------------------------------------
# Parameters (deterministic synthetic init: weights ~ N(0,0.001), biases = 0,
# matching normal_init in the PyTorch module). PyTorch layouts kept: (O,I,KH,KW)
# -----------------------------------------------------------------------------
def init_params(key, feat_in, feat_out):
    def conv_w(k, cout, cin, kh, kw):
        return jax.random.normal(k, (cout, cin, kh, kw), jnp.float32) * 0.001

    k0, k1, k2, k3, k4 = jax.random.split(key, 5)
    return {
        "cls": {  # UPXCorr(out_channels=1, adjust=False)
            "kernel_w": conv_w(k0, feat_out * 1, feat_in, 3, 3),
            "kernel_b": jnp.zeros((feat_out * 1,), jnp.float32),
            "search_w": conv_w(k1, feat_out, feat_in, 3, 3),
            "search_b": jnp.zeros((feat_out,), jnp.float32),
        },
        "loc": {  # UPXCorr(out_channels=4, adjust=True)
            "kernel_w": conv_w(k2, feat_out * 4, feat_in, 3, 3),
            "kernel_b": jnp.zeros((feat_out * 4,), jnp.float32),
            "search_w": conv_w(k3, feat_out, feat_in, 3, 3),
            "search_b": jnp.zeros((feat_out,), jnp.float32),
            "adjust_w": conv_w(k4, 4, 4, 1, 1),
            "adjust_b": jnp.zeros((4,), jnp.float32),
        },
    }


# -----------------------------------------------------------------------------
# Pure-JAX reference (mirrors the PyTorch code in NCHW) for correctness check.
# -----------------------------------------------------------------------------
def _ref_conv(x, w, b):
    out = lax.conv_general_dilated(x, w, (1, 1), "VALID",
                                   dimension_numbers=("NCHW", "OIHW", "NCHW"))
    return out + b[None, :, None, None]


def _ref_xcorr_up(search, kernel, oc):
    B, F, Hs, Ws = search.shape
    _, _, Hk, Wk = kernel.shape
    outs = []
    for b in range(B):
        w = kernel[b].reshape(oc, F, Hk, Wk)
        o = lax.conv_general_dilated(search[b:b + 1], w, (1, 1), "VALID",
                                     dimension_numbers=("NCHW", "OIHW", "NCHW"))
        outs.append(o)
    return jnp.concatenate(outs, axis=0)


def ref_forward(params, z_f, x_f):
    z_c = z_f[:, :, 4:-4, 4:-4]

    def branch(p, oc):
        kernel = _ref_conv(z_c, p["kernel_w"], p["kernel_b"])
        search = _ref_conv(x_f, p["search_w"], p["search_b"])
        out = _ref_xcorr_up(search, kernel, oc)
        if "adjust_w" in p:
            out = jnp.einsum("bchw,oc->bohw", out, p["adjust_w"][:, :, 0, 0]) \
                  + p["adjust_b"][None, :, None, None]
        return out

    return branch(params["loc"], 4), branch(params["cls"], 1)


if __name__ == "__main__":
    B, feat_in, feat_out = 2, 8, 8
    key = jax.random.PRNGKey(0)
    kz, kx, kp = jax.random.split(key, 3)
    z_f = jax.random.normal(kz, (B, feat_in, 14, 14), jnp.float32)  # template
    x_f = jax.random.normal(kx, (B, feat_in, 16, 16), jnp.float32)  # search
    params = init_params(kp, feat_in, feat_out)

    fwd = jax.jit(functools.partial(up_channel_siamese_forward, feat_out=feat_out))
    loc, cls = fwd(params, z_f, x_f)
    jax.block_until_ready((loc, cls))

    loc_ref, cls_ref = ref_forward(params, z_f, x_f)
    assert loc.shape == (B, 4, 11, 11), loc.shape
    assert cls.shape == (B, 1, 11, 11), cls.shape
    assert jnp.allclose(loc, loc_ref, rtol=1e-3, atol=1e-6), "loc mismatch"
    assert jnp.allclose(cls, cls_ref, rtol=1e-3, atol=1e-6), "cls mismatch"
    print("KERNEL_OK")
</pallas_src>

<mosaic_0001>
module attributes {stable_mosaic.version = 11 : i64} {
  func.func @_fused_kernel(%arg0: i32, %arg1: memref<1x72x16xf32, #tpu.memory_space<vmem>>, %arg2: memref<1x72x196xf32, #tpu.memory_space<vmem>>, %arg3: memref<40x72xf32, #tpu.memory_space<vmem>>, %arg4: memref<16x72xf32, #tpu.memory_space<vmem>>, %arg5: memref<40x1xf32, #tpu.memory_space<vmem>>, %arg6: memref<16x1xf32, #tpu.memory_space<vmem>>, %arg7: memref<4x1xf32, #tpu.memory_space<vmem>>, %arg8: memref<128x128xf32, #tpu.memory_space<vmem>>, %arg9: memref<1x5x196xf32, #tpu.memory_space<vmem>>, %arg10: memref<16x241xf32, #tpu.memory_space<vmem>>, %arg11: memref<256x196xf32, #tpu.memory_space<vmem>>, %arg12: memref<5x128xf32, #tpu.memory_space<vmem>>) attributes {dimension_semantics = [#tpu.dimension_semantics<parallel>], iteration_bounds = array<i64: 2>, scalar_prefetch = 0 : i64, scratch_operands = 3 : i64, tpu.core_type = #tpu.core_type<tc>, window_params = [{transform_indices = @transform_0, window_bounds = array<i64: 1, 72, 16>}, {transform_indices = @transform_1, window_bounds = array<i64: 1, 72, 196>}, {pipeline_mode = #tpu.pipeline_mode<synchronous>, transform_indices = @transform_2, window_bounds = array<i64: 40, 72>}, {pipeline_mode = #tpu.pipeline_mode<synchronous>, transform_indices = @transform_3, window_bounds = array<i64: 16, 72>}, {pipeline_mode = #tpu.pipeline_mode<synchronous>, transform_indices = @transform_4, window_bounds = array<i64: 40, 1>}, {pipeline_mode = #tpu.pipeline_mode<synchronous>, transform_indices = @transform_5, window_bounds = array<i64: 16, 1>}, {pipeline_mode = #tpu.pipeline_mode<synchronous>, transform_indices = @transform_6, window_bounds = array<i64: 4, 1>}, {pipeline_mode = #tpu.pipeline_mode<synchronous>, transform_indices = @transform_7, window_bounds = array<i64: 128, 128>}, {transform_indices = @transform_8, window_bounds = array<i64: 1, 5, 196>}]} {
    %c0 = arith.constant 0 : index
    %c0_0 = arith.constant 0 : index
    %0 = vector.load %arg4[%c0, %c0_0] : memref<16x72xf32, #tpu.memory_space<vmem>>, vector<16x72xf32>
    %c0_1 = arith.constant 0 : index
    %c0_2 = arith.constant 0 : index
    %c0_3 = arith.constant 0 : index
    %1 = vector.load %arg2[%c0_1, %c0_2, %c0_3] : memref<1x72x196xf32, #tpu.memory_space<vmem>>, vector<1x72x196xf32>
    %2 = vector.shape_cast %1 : vector<1x72x196xf32> to vector<72x196xf32>
    %cst = arith.constant dense<0.000000e+00> : vector<16x196xf32>
    %3 = tpu.matmul %0, %2, %cst {dimension_numbers = #tpu.dot_dimension_numbers<[1], [0], [0], [1], [0, 0, 1, 1], [], []>} : vector<16x72xf32>, vector<72x196xf32>, vector<16x196xf32> -> vector<16x196xf32>
    %c0_4 = arith.constant 0 : index
    %c0_5 = arith.constant 0 : index
    %4 = vector.load %arg6[%c0_4, %c0_5] : memref<16x1xf32, #tpu.memory_space<vmem>>, vector<16x1xf32>
    %5 = vector.broadcast %4 : vector<16x1xf32> to vector<16x196xf32>
    %6 = arith.addf %3, %5 : vector<16x196xf32>
    %c0_6 = arith.constant 0 : index
    %c0_7 = arith.constant 0 : index
    %7 = vector.load %arg10[%c0_6, %c0_7] : memref<16x241xf32, #tpu.memory_space<vmem>>, vector<16x196xf32>
    tpu.vector_store %arg10[%c0_6, %c0_7], %6 {strides = array<i32>} : memref<16x241xf32, #tpu.memory_space<vmem>>, vector<16x196xf32>,
    %cst_8 = arith.constant 0.000000e+00 : f32
    %8 = vector.broadcast %cst_8 : f32 to vector<16x45xf32>
    %c0_9 = arith.constant 0 : index
    %c196 = arith.constant 196 : index
    %9 = vector.load %arg10[%c0_9, %c196] : memref<16x241xf32, #tpu.memory_space<vmem>>, vector<16x45xf32>
    tpu.vector_store %arg10[%c0_9, %c196], %8 {strides = array<i32>} : memref<16x241xf32, #tpu.memory_space<vmem>>, vector<16x45xf32>,
    %c0_10 = arith.constant 0 : index
    %c0_11 = arith.constant 0 : index
    %10 = vector.load %arg3[%c0_10, %c0_11] : memref<40x72xf32, #tpu.memory_space<vmem>>, vector<40x72xf32>
    %c0_12 = arith.constant 0 : index
    %c0_13 = arith.constant 0 : index
    %c0_14 = arith.constant 0 : index
    %11 = vector.load %arg1[%c0_12, %c0_13, %c0_14] : memref<1x72x16xf32, #tpu.memory_space<vmem>>, vector<1x72x16xf32>
    %12 = vector.shape_cast %11 : vector<1x72x16xf32> to vector<72x16xf32>
    %cst_15 = arith.constant dense<0.000000e+00> : vector<40x16xf32>
    %13 = tpu.matmul %10, %12, %cst_15 {dimension_numbers = #tpu.dot_dimension_numbers<[1], [0], [0], [1], [0, 0, 1, 1], [], []>} : vector<40x72xf32>, vector<72x16xf32>, vector<40x16xf32> -> vector<40x16xf32>
    %c0_16 = arith.constant 0 : index
    %c0_17 = arith.constant 0 : index
    %14 = vector.load %arg5[%c0_16, %c0_17] : memref<40x1xf32, #tpu.memory_space<vmem>>, vector<40x1xf32>
    %15 = vector.broadcast %14 : vector<40x1xf32> to vector<40x16xf32>
    %16 = arith.addf %13, %15 : vector<40x16xf32>
    %17 = vector.extract_strided_slice %16 {offsets = [0, 0], sizes = [5, 16], strides = [1, 1]} : vector<40x16xf32> to vector<5x16xf32>
    %c0_18 = arith.constant 0 : index
    %c0_19 = arith.constant 0 : index
    %18 = vector.load %arg12[%c0_18, %c0_19] : memref<5x128xf32, #tpu.memory_space<vmem>>, vector<5x16xf32>
    tpu.vector_store %arg12[%c0_18, %c0_19], %17 {strides = array<i32>} : memref<5x128xf32, #tpu.memory_space<vmem>>, vector<5x16xf32>,
    %19 = vector.extract_strided_slice %16 {offsets = [5, 0], sizes = [5, 16], strides = [1, 1]} : vector<40x16xf32> to vector<5x16xf32>
    %c0_20 = arith.constant 0 : index
    %c16 = arith.constant 16 : index
    %20 = vector.load %arg12[%c0_20, %c16] : memref<5x128xf32, #tpu.memory_space<vmem>>, vector<5x16xf32>
    tpu.vector_store %arg12[%c0_20, %c16], %19 {strides = array<i32>} : memref<5x128xf32, #tpu.memory_space<vmem>>, vector<5x16xf32>,
    %21 = vector.extract_strided_slice %16 {offsets = [10, 0], sizes = [5, 16], strides = [1, 1]} : vector<40x16xf32> to vector<5x16xf32>
    %c0_21 = arith.constant 0 : index
    %c32 = arith.constant 32 : index
    %22 = vector.load %arg12[%c0_21, %c32] : memref<5x128xf32, #tpu.memory_space<vmem>>, vector<5x16xf32>
    tpu.vector_store %arg12[%c0_21, %c32], %21 {strides = array<i32>} : memref<5x128xf32, #tpu.memory_space<vmem>>, vector<5x16xf32>,
    %23 = vector.extract_strided_slice %16 {offsets = [15, 0], sizes = [5, 16], strides = [1, 1]} : vector<40x16xf32> to vector<5x16xf32>
    %c0_22 = arith.constant 0 : index
    %c48 = arith.constant 48 : index
    %24 = vector.load %arg12[%c0_22, %c48] : memref<5x128xf32, #tpu.memory_space<vmem>>, vector<5x16xf32>
    tpu.vector_store %arg12[%c0_22, %c48], %23 {strides = array<i32>} : memref<5x128xf32, #tpu.memory_space<vmem>>, vector<5x16xf32>,
    %25 = vector.extract_strided_slice %16 {offsets = [20, 0], sizes = [5, 16], strides = [1, 1]} : vector<40x16xf32> to vector<5x16xf32>
    %c0_23 = arith.constant 0 : index
    %c64 = arith.constant 64 : index
    %26 = vector.load %arg12[%c0_23, %c64] : memref<5x128xf32, #tpu.memory_space<vmem>>, vector<5x16xf32>
    tpu.vector_store %arg12[%c0_23, %c64], %25 {strides = array<i32>} : memref<5x128xf32, #tpu.memory_space<vmem>>, vector<5x16xf32>,
    %27 = vector.extract_strided_slice %16 {offsets = [25, 0], sizes = [5, 16], strides = [1, 1]} : vector<40x16xf32> to vector<5x16xf32>
    %c0_24 = arith.constant 0 : index
    %c80 = arith.constant 80 : index
    %28 = vector.load %arg12[%c0_24, %c80] : memref<5x128xf32, #tpu.memory_space<vmem>>, vector<5x16xf32>
    tpu.vector_store %arg12[%c0_24, %c80], %27 {strides = array<i32>} : memref<5x128xf32, #tpu.memory_space<vmem>>, vector<5x16xf32>,
    %29 = vector.extract_strided_slice %16 {offsets = [30, 0], sizes = [5, 16], strides = [1, 1]} : vector<40x16xf32> to vector<5x16xf32>
    %c0_25 = arith.constant 0 : index
    %c96 = arith.constant 96 : index
    %30 = vector.load %arg12[%c0_25, %c96] : memref<5x128xf32, #tpu.memory_space<vmem>>, vector<5x16xf32>
    tpu.vector_store %arg12[%c0_25, %c96], %29 {strides = array<i32>} : memref<5x128xf32, #tpu.memory_space<vmem>>, vector<5x16xf32>,
    %31 = vector.extract_strided_slice %16 {offsets = [35, 0], sizes = [5, 16], strides = [1, 1]} : vector<40x16xf32> to vector<5x16xf32>
    %c0_26 = arith.constant 0 : index
    %c112 = arith.constant 112 : index
    %32 = vector.load %arg12[%c0_26, %c112] : memref<5x128xf32, #tpu.memory_space<vmem>>, vector<5x16xf32>
    tpu.vector_store %arg12[%c0_26, %c112], %31 {strides = array<i32>} : memref<5x128xf32, #tpu.memory_space<vmem>>, vector<5x16xf32>,
    %c0_27 = arith.constant 0 : index
    %c0_28 = arith.constant 0 : index
    %33 = vector.load %arg12[%c0_27, %c0_28] : memref<5x128xf32, #tpu.memory_space<vmem>>, vector<5x128xf32>
    %c0_29 = arith.constant 0 : index
    %c0_30 = arith.constant 0 : index
    %34 = vector.load %arg8[%c0_29, %c0_30] : memref<128x128xf32, #tpu.memory_space<vmem>>, vector<128x128xf32>
    %cst_31 = arith.constant dense<0.000000e+00> : vector<5x128xf32>
    %35 = tpu.matmul %33, %34, %cst_31 {dimension_numbers = #tpu.dot_dimension_numbers<[1], [0], [0], [1], [0, 0, 1, 1], [], []>} : vector<5x128xf32>, vector<128x128xf32>, vector<5x128xf32> -> vector<5x128xf32>
    %c0_32 = arith.constant 0 : index
    %c0_33 = arith.constant 0 : index
    %36 = vector.load %arg10[%c0_32, %c0_33] : memref<16x241xf32, #tpu.memory_space<vmem>>, vector<16x196xf32>
    %37 = vector.extract_strided_slice %36 {offsets = [0, 0], sizes = [8, 196], strides = [1, 1]} : vector<16x196xf32> to vector<8x196xf32>
    %c0_34 = arith.constant 0 : index
    %c0_35 = arith.constant 0 : index
    %38 = vector.load %arg11[%c0_34, %c0_35] : memref<256x196xf32, #tpu.memory_space<vmem>>, vector<8x196xf32>
    tpu.vector_store %arg11[%c0_34, %c0_35], %37 {strides = array<i32>} : memref<256x196xf32, #tpu.memory_space<vmem>>, vector<8x196xf32>,
    %39 = vector.extract_strided_slice %36 {offsets = [8, 0], sizes = [8, 196], strides = [1, 1]} : vector<16x196xf32> to vector<8x196xf32>
    %c128 = arith.constant 128 : index
    %c0_36 = arith.constant 0 : index
    %40 = vector.load %arg11[%c128, %c0_36] : memref<256x196xf32, #tpu.memory_space<vmem>>, vector<8x196xf32>
    tpu.vector_store %arg11[%c128, %c0_36], %39 {strides = array<i32>} : memref<256x196xf32, #tpu.memory_space<vmem>>, vector<8x196xf32>,
    %c0_37 = arith.constant 0 : index
    %c1 = arith.constant 1 : index
    %41 = vector.load %arg10[%c0_37, %c1] : memref<16x241xf32, #tpu.memory_space<vmem>>, vector<16x196xf32>
    %42 = vector.extract_strided_slice %41 {offsets = [0, 0], sizes = [8, 196], strides = [1, 1]} : vector<16x196xf32> to vector<8x196xf32>
    %c8 = arith.constant 8 : index
    %c0_38 = arith.constant 0 : index
    %43 = vector.load %arg11[%c8, %c0_38] : memref<256x196xf32, #tpu.memory_space<vmem>>, vector<8x196xf32>
    tpu.vector_store %arg11[%c8, %c0_38], %42 {strides = array<i32>} : memref<256x196xf32, #tpu.memory_space<vmem>>, vector<8x196xf32>,
    %44 = vector.extract_strided_slice %41 {offsets = [8, 0], sizes = [8, 196], strides = [1, 1]} : vector<16x196xf32> to vector<8x196xf32>
    %c136 = arith.constant 136 : index
    %c0_39 = arith.constant 0 : index
    %45 = vector.load %arg11[%c136, %c0_39] : memref<256x196xf32, #tpu.memory_space<vmem>>, vector<8x196xf32>
    tpu.vector_store %arg11[%c136, %c0_39], %44 {strides = array<i32>} : memref<256x196xf32, #tpu.memory_space<vmem>>, vector<8x196xf32>,
    %c0_40 = arith.constant 0 : index
    %c2 = arith.constant 2 : index
    %46 = vector.load %arg10[%c0_40, %c2] : memref<16x241xf32, #tpu.memory_space<vmem>>, vector<16x196xf32>
    %47 = vector.extract_strided_slice %46 {offsets = [0, 0], sizes = [8, 196], strides = [1, 1]} : vector<16x196xf32> to vector<8x196xf32>
    %c16_41 = arith.constant 16 : index
    %c0_42 = arith.constant 0 : index
    %48 = vector.load %arg11[%c16_41, %c0_42] : memref<256x196xf32, #tpu.memory_space<vmem>>, vector<8x196xf32>
    tpu.vector_store %arg11[%c16_41, %c0_42], %47 {strides = array<i32>} : memref<256x196xf32, #tpu.memory_space<vmem>>, vector<8x196xf32>,
    %49 = vector.extract_strided_slice %46 {offsets = [8, 0], sizes = [8, 196], strides = [1, 1]} : vector<16x196xf32> to vector<8x196xf32>
    %c144 = arith.constant 144 : index
    %c0_43 = arith.constant 0 : index
    %50 = vector.load %arg11[%c144, %c0_43] : memref<256x196xf32, #tpu.memory_space<vmem>>, vector<8x196xf32>
    tpu.vector_store %arg11[%c144, %c0_43], %49 {strides = array<i32>} : memref<256x196xf32, #tpu.memory_space<vmem>>, vector<8x196xf32>,
    %c0_44 = arith.constant 0 : index
    %c3 = arith.constant 3 : index
    %51 = vector.load %arg10[%c0_44, %c3] : memref<16x241xf32, #tpu.memory_space<vmem>>, vector<16x196xf32>
    %52 = vector.extract_strided_slice %51 {offsets = [0, 0], sizes = [8, 196], strides = [1, 1]} : vector<16x196xf32> to vector<8x196xf32>
    %c24 = arith.constant 24 : index
    %c0_45 = arith.constant 0 : index
    %53 = vector.load %arg11[%c24, %c0_45] : memref<256x196xf32, #tpu.memory_space<vmem>>, vector<8x196xf32>
    tpu.vector_store %arg11[%c24, %c0_45], %52 {strides = array<i32>} : memref<256x196xf32, #tpu.memory_space<vmem>>, vector<8x196xf32>,
    %54 = vector.extract_strided_slice %51 {offsets = [8, 0], sizes = [8, 196], strides = [1, 1]} : vector<16x196xf32> to vector<8x196xf32>
    %c152 = arith.constant 152 : index
    %c0_46 = arith.constant 0 : index
    %55 = vector.load %arg11[%c152, %c0_46] : memref<256x196xf32, #tpu.memory_space<vmem>>, vector<8x196xf32>
    tpu.vector_store %arg11[%c152, %c0_46], %54 {strides = array<i32>} : memref<256x196xf32, #tpu.memory_space<vmem>>, vector<8x196xf32>,
    %c0_47 = arith.constant 0 : index
    %c14 = arith.constant 14 : index
    %56 = vector.load %arg10[%c0_47, %c14] : memref<16x241xf32, #tpu.memory_space<vmem>>, vector<16x196xf32>
    %57 = vector.extract_strided_slice %56 {offsets = [0, 0], sizes = [8, 196], strides = [1, 1]} : vector<16x196xf32> to vector<8x196xf32>
    %c32_48 = arith.constant 32 : index
    %c0_49 = arith.constant 0 : index
    %58 = vector.load %arg11[%c32_48, %c0_49] : memref<256x196xf32, #tpu.memory_space<vmem>>, vector<8x196xf32>
    tpu.vector_store %arg11[%c32_48, %c0_49], %57 {strides = array<i32>} : memref<256x196xf32, #tpu.memory_space<vmem>>, vector<8x196xf32>,
    %59 = vector.extract_strided_slice %56 {offsets = [8, 0], sizes = [8, 196], strides = [1, 1]} : vector<16x196xf32> to vector<8x196xf32>
    %c160 = arith.constant 160 : index
    %c0_50 = arith.constant 0 : index
    %60 = vector.load %arg11[%c160, %c0_50] : memref<256x196xf32, #tpu.memory_space<vmem>>, vector<8x196xf32>
    tpu.vector_store %arg11[%c160, %c0_50], %59 {strides = array<i32>} : memref<256x196xf32, #tpu.memory_space<vmem>>, vector<8x196xf32>,
    %c0_51 = arith.constant 0 : index
    %c15 = arith.constant 15 : index
    %61 = vector.load %arg10[%c0_51, %c15] : memref<16x241xf32, #tpu.memory_space<vmem>>, vector<16x196xf32>
    %62 = vector.extract_strided_slice %61 {offsets = [0, 0], sizes = [8, 196], strides = [1, 1]} : vector<16x196xf32> to vector<8x196xf32>
    %c40 = arith.constant 40 : index
    %c0_52 = arith.constant 0 : index
    %63 = vector.load %arg11[%c40, %c0_52] : memref<256x196xf32, #tpu.memory_space<vmem>>, vector<8x196xf32>
    tpu.vector_store %arg11[%c40, %c0_52], %62 {strides = array<i32>} : memref<256x196xf32, #tpu.memory_space<vmem>>, vector<8x196xf32>,
    %64 = vector.extract_strided_slice %61 {offsets = [8, 0], sizes = [8, 196], strides = [1, 1]} : vector<16x196xf32> to vector<8x196xf32>
    %c168 = arith.constant 168 : index
    %c0_53 = arith.constant 0 : index
    %65 = vector.load %arg11[%c168, %c0_53] : memref<256x196xf32, #tpu.memory_space<vmem>>, vector<8x196xf32>
    tpu.vector_store %arg11[%c168, %c0_53], %64 {strides = array<i32>} : memref<256x196xf32, #tpu.memory_space<vmem>>, vector<8x196xf32>,
    %c0_54 = arith.constant 0 : index
    %c16_55 = arith.constant 16 : index
    %66 = vector.load %arg10[%c0_54, %c16_55] : memref<16x241xf32, #tpu.memory_space<vmem>>, vector<16x196xf32>
    %67 = vector.extract_strided_slice %66 {offsets = [0, 0], sizes = [8, 196], strides = [1, 1]} : vector<16x196xf32> to vector<8x196xf32>
    %c48_56 = arith.constant 48 : index
    %c0_57 = arith.constant 0 : index
    %68 = vector.load %arg11[%c48_56, %c0_57] : memref<256x196xf32, #tpu.memory_space<vmem>>, vector<8x196xf32>
    tpu.vector_store %arg11[%c48_56, %c0_57], %67 {strides = array<i32>} : memref<256x196xf32, #tpu.memory_space<vmem>>, vector<8x196xf32>,
    %69 = vector.extract_strided_slice %66 {offsets = [8, 0], sizes = [8, 196], strides = [1, 1]} : vector<16x196xf32> to vector<8x196xf32>
    %c176 = arith.constant 176 : index
    %c0_58 = arith.constant 0 : index
    %70 = vector.load %arg11[%c176, %c0_58] : memref<256x196xf32, #tpu.memory_space<vmem>>, vector<8x196xf32>
    tpu.vector_store %arg11[%c176, %c0_58], %69 {strides = array<i32>} : memref<256x196xf32, #tpu.memory_space<vmem>>, vector<8x196xf32>,
    %c0_59 = arith.constant 0 : index
    %c17 = arith.constant 17 : index
    %71 = vector.load %arg10[%c0_59, %c17] : memref<16x241xf32, #tpu.memory_space<vmem>>, vector<16x196xf32>
    %72 = vector.extract_strided_slice %71 {offsets = [0, 0], sizes = [8, 196], strides = [1, 1]} : vector<16x196xf32> to vector<8x196xf32>
    %c56 = arith.constant 56 : index
    %c0_60 = arith.constant 0 : index
    %73 = vector.load %arg11[%c56, %c0_60] : memref<256x196xf32, #tpu.memory_space<vmem>>, vector<8x196xf32>
    tpu.vector_store %arg11[%c56, %c0_60], %72 {strides = array<i32>} : memref<256x196xf32, #tpu.memory_space<vmem>>, vector<8x196xf32>,
    %74 = vector.extract_strided_slice %71 {offsets = [8, 0], sizes = [8, 196], strides = [1, 1]} : vector<16x196xf32> to vector<8x196xf32>
    %c184 = arith.constant 184 : index
    %c0_61 = arith.constant 0 : index
    %75 = vector.load %arg11[%c184, %c0_61] : memref<256x196xf32, #tpu.memory_space<vmem>>, vector<8x196xf32>
    tpu.vector_store %arg11[%c184, %c0_61], %74 {strides = array<i32>} : memref<256x196xf32, #tpu.memory_space<vmem>>, vector<8x196xf32>,
    %c0_62 = arith.constant 0 : index
    %c28 = arith.constant 28 : index
    %76 = vector.load %arg10[%c0_62, %c28] : memref<16x241xf32, #tpu.memory_space<vmem>>, vector<16x196xf32>
    %77 = vector.extract_strided_slice %76 {offsets = [0, 0], sizes = [8, 196], strides = [1, 1]} : vector<16x196xf32> to vector<8x196xf32>
    %c64_63 = arith.constant 64 : index
    %c0_64 = arith.constant 0 : index
    %78 = vector.load %arg11[%c64_63, %c0_64] : memref<256x196xf32, #tpu.memory_space<vmem>>, vector<8x196xf32>
    tpu.vector_store %arg11[%c64_63, %c0_64], %77 {strides = array<i32>} : memref<256x196xf32, #tpu.memory_space<vmem>>, vector<8x196xf32>,
    %79 = vector.extract_strided_slice %76 {offsets = [8, 0], sizes = [8, 196], strides = [1, 1]} : vector<16x196xf32> to vector<8x196xf32>
    %c192 = arith.constant 192 : index
    %c0_65 = arith.constant 0 : index
    %80 = vector.load %arg11[%c192, %c0_65] : memref<256x196xf32, #tpu.memory_space<vmem>>, vector<8x196xf32>
    tpu.vector_store %arg11[%c192, %c0_65], %79 {strides = array<i32>} : memref<256x196xf32, #tpu.memory_space<vmem>>, vector<8x196xf32>,
    %c0_66 = arith.constant 0 : index
    %c29 = arith.constant 29 : index
    %81 = vector.load %arg10[%c0_66, %c29] : memref<16x241xf32, #tpu.memory_space<vmem>>, vector<16x196xf32>
    %82 = vector.extract_strided_slice %81 {offsets = [0, 0], sizes = [8, 196], strides = [1, 1]} : vector<16x196xf32> to vector<8x196xf32>
    %c72 = arith.constant 72 : index
    %c0_67 = arith.constant 0 : index
    %83 = vector.load %arg11[%c72, %c0_67] : memref<256x196xf32, #tpu.memory_space<vmem>>, vector<8x196xf32>
    tpu.vector_store %arg11[%c72, %c0_67], %82 {strides = array<i32>} : memref<256x196xf32, #tpu.memory_space<vmem>>, vector<8x196xf32>,
    %84 = vector.extract_strided_slice %81 {offsets = [8, 0], sizes = [8, 196], strides = [1, 1]} : vector<16x196xf32> to vector<8x196xf32>
    %c200 = arith.constant 200 : index
    %c0_68 = arith.constant 0 : index
    %85 = vector.load %arg11[%c200, %c0_68] : memref<256x196xf32, #tpu.memory_space<vmem>>, vector<8x196xf32>
    tpu.vector_store %arg11[%c200, %c0_68], %84 {strides = array<i32>} : memref<256x196xf32, #tpu.memory_space<vmem>>, vector<8x196xf32>,
    %c0_69 = arith.constant 0 : index
    %c30 = arith.constant 30 : index
    %86 = vector.load %arg10[%c0_69, %c30] : memref<16x241xf32, #tpu.memory_space<vmem>>, vector<16x196xf32>
    %87 = vector.extract_strided_slice %86 {offsets = [0, 0], sizes = [8, 196], strides = [1, 1]} : vector<16x196xf32> to vector<8x196xf32>
    %c80_70 = arith.constant 80 : index
    %c0_71 = arith.constant 0 : index
    %88 = vector.load %arg11[%c80_70, %c0_71] : memref<256x196xf32, #tpu.memory_space<vmem>>, vector<8x196xf32>
    tpu.vector_store %arg11[%c80_70, %c0_71], %87 {strides = array<i32>} : memref<256x196xf32, #tpu.memory_space<vmem>>, vector<8x196xf32>,
    %89 = vector.extract_strided_slice %86 {offsets = [8, 0], sizes = [8, 196], strides = [1, 1]} : vector<16x196xf32> to vector<8x196xf32>
    %c208 = arith.constant 208 : index
    %c0_72 = arith.constant 0 : index
    %90 = vector.load %arg11[%c208, %c0_72] : memref<256x196xf32, #tpu.memory_space<vmem>>, vector<8x196xf32>
    tpu.vector_store %arg11[%c208, %c0_72], %89 {strides = array<i32>} : memref<256x196xf32, #tpu.memory_space<vmem>>, vector<8x196xf32>,
    %c0_73 = arith.constant 0 : index
    %c31 = arith.constant 31 : index
    %91 = vector.load %arg10[%c0_73, %c31] : memref<16x241xf32, #tpu.memory_space<vmem>>, vector<16x196xf32>
    %92 = vector.extract_strided_slice %91 {offsets = [0, 0], sizes = [8, 196], strides = [1, 1]} : vector<16x196xf32> to vector<8x196xf32>
    %c88 = arith.constant 88 : index
    %c0_74 = arith.constant 0 : index
    %93 = vector.load %arg11[%c88, %c0_74] : memref<256x196xf32, #tpu.memory_space<vmem>>, vector<8x196xf32>
    tpu.vector_store %arg11[%c88, %c0_74], %92 {strides = array<i32>} : memref<256x196xf32, #tpu.memory_space<vmem>>, vector<8x196xf32>,
    %94 = vector.extract_strided_slice %91 {offsets = [8, 0], sizes = [8, 196], strides = [1, 1]} : vector<16x196xf32> to vector<8x196xf32>
    %c216 = arith.constant 216 : index
    %c0_75 = arith.constant 0 : index
    %95 = vector.load %arg11[%c216, %c0_75] : memref<256x196xf32, #tpu.memory_space<vmem>>, vector<8x196xf32>
    tpu.vector_store %arg11[%c216, %c0_75], %94 {strides = array<i32>} : memref<256x196xf32, #tpu.memory_space<vmem>>, vector<8x196xf32>,
    %c0_76 = arith.constant 0 : index
    %c42 = arith.constant 42 : index
    %96 = vector.load %arg10[%c0_76, %c42] : memref<16x241xf32, #tpu.memory_space<vmem>>, vector<16x196xf32>
    %97 = vector.extract_strided_slice %96 {offsets = [0, 0], sizes = [8, 196], strides = [1, 1]} : vector<16x196xf32> to vector<8x196xf32>
    %c96_77 = arith.constant 96 : index
    %c0_78 = arith.constant 0 : index
    %98 = vector.load %arg11[%c96_77, %c0_78] : memref<256x196xf32, #tpu.memory_space<vmem>>, vector<8x196xf32>
    tpu.vector_store %arg11[%c96_77, %c0_78], %97 {strides = array<i32>} : memref<256x196xf32, #tpu.memory_space<vmem>>, vector<8x196xf32>,
    %99 = vector.extract_strided_slice %96 {offsets = [8, 0], sizes = [8, 196], strides = [1, 1]} : vector<16x196xf32> to vector<8x196xf32>
    %c224 = arith.constant 224 : index
    %c0_79 = arith.constant 0 : index
    %100 = vector.load %arg11[%c224, %c0_79] : memref<256x196xf32, #tpu.memory_space<vmem>>, vector<8x196xf32>
    tpu.vector_store %arg11[%c224, %c0_79], %99 {strides = array<i32>} : memref<256x196xf32, #tpu.memory_space<vmem>>, vector<8x196xf32>,
    %c0_80 = arith.constant 0 : index
    %c43 = arith.constant 43 : index
    %101 = vector.load %arg10[%c0_80, %c43] : memref<16x241xf32, #tpu.memory_space<vmem>>, vector<16x196xf32>
    %102 = vector.extract_strided_slice %101 {offsets = [0, 0], sizes = [8, 196], strides = [1, 1]} : vector<16x196xf32> to vector<8x196xf32>
    %c104 = arith.constant 104 : index
    %c0_81 = arith.constant 0 : index
    %103 = vector.load %arg11[%c104, %c0_81] : memref<256x196xf32, #tpu.memory_space<vmem>>, vector<8x196xf32>
    tpu.vector_store %arg11[%c104, %c0_81], %102 {strides = array<i32>} : memref<256x196xf32, #tpu.memory_space<vmem>>, vector<8x196xf32>,
    %104 = vector.extract_strided_slice %101 {offsets = [8, 0], sizes = [8, 196], strides = [1, 1]} : vector<16x196xf32> to vector<8x196xf32>
    %c232 = arith.constant 232 : index
    %c0_82 = arith.constant 0 : index
    %105 = vector.load %arg11[%c232, %c0_82] : memref<256x196xf32, #tpu.memory_space<vmem>>, vector<8x196xf32>
    tpu.vector_store %arg11[%c232, %c0_82], %104 {strides = array<i32>} : memref<256x196xf32, #tpu.memory_space<vmem>>, vector<8x196xf32>,
    %c0_83 = arith.constant 0 : index
    %c44 = arith.constant 44 : index
    %106 = vector.load %arg10[%c0_83, %c44] : memref<16x241xf32, #tpu.memory_space<vmem>>, vector<16x196xf32>
    %107 = vector.extract_strided_slice %106 {offsets = [0, 0], sizes = [8, 196], strides = [1, 1]} : vector<16x196xf32> to vector<8x196xf32>
    %c112_84 = arith.constant 112 : index
    %c0_85 = arith.constant 0 : index
    %108 = vector.load %arg11[%c112_84, %c0_85] : memref<256x196xf32, #tpu.memory_space<vmem>>, vector<8x196xf32>
    tpu.vector_store %arg11[%c112_84, %c0_85], %107 {strides = array<i32>} : memref<256x196xf32, #tpu.memory_space<vmem>>, vector<8x196xf32>,
    %109 = vector.extract_strided_slice %106 {offsets = [8, 0], sizes = [8, 196], strides = [1, 1]} : vector<16x196xf32> to vector<8x196xf32>
    %c240 = arith.constant 240 : index
    %c0_86 = arith.constant 0 : index
    %110 = vector.load %arg11[%c240, %c0_86] : memref<256x196xf32, #tpu.memory_space<vmem>>, vector<8x196xf32>
    tpu.vector_store %arg11[%c240, %c0_86], %109 {strides = array<i32>} : memref<256x196xf32, #tpu.memory_space<vmem>>, vector<8x196xf32>,
    %c0_87 = arith.constant 0 : index
    %c45 = arith.constant 45 : index
    %111 = vector.load %arg10[%c0_87, %c45] : memref<16x241xf32, #tpu.memory_space<vmem>>, vector<16x196xf32>
    %112 = vector.extract_strided_slice %111 {offsets = [0, 0], sizes = [8, 196], strides = [1, 1]} : vector<16x196xf32> to vector<8x196xf32>
    %c120 = arith.constant 120 : index
    %c0_88 = arith.constant 0 : index
    %113 = vector.load %arg11[%c120, %c0_88] : memref<256x196xf32, #tpu.memory_space<vmem>>, vector<8x196xf32>
    tpu.vector_store %arg11[%c120, %c0_88], %112 {strides = array<i32>} : memref<256x196xf32, #tpu.memory_space<vmem>>, vector<8x196xf32>,
    %114 = vector.extract_strided_slice %111 {offsets = [8, 0], sizes = [8, 196], strides = [1, 1]} : vector<16x196xf32> to vector<8x196xf32>
    %c248 = arith.constant 248 : index
    %c0_89 = arith.constant 0 : index
    %115 = vector.load %arg11[%c248, %c0_89] : memref<256x196xf32, #tpu.memory_space<vmem>>, vector<8x196xf32>
    tpu.vector_store %arg11[%c248, %c0_89], %114 {strides = array<i32>} : memref<256x196xf32, #tpu.memory_space<vmem>>, vector<8x196xf32>,
    %116 = vector.extract_strided_slice %35 {offsets = [0, 0], sizes = [1, 128], strides = [1, 1]} : vector<5x128xf32> to vector<1x128xf32>
    %c0_90 = arith.constant 0 : index
    %c0_91 = arith.constant 0 : index
    %117 = vector.load %arg11[%c0_90, %c0_91] : memref<256x196xf32, #tpu.memory_space<vmem>>, vector<128x196xf32>
    %cst_92 = arith.constant dense<0.000000e+00> : vector<1x196xf32>
    %118 = tpu.matmul %116, %117, %cst_92 {dimension_numbers = #tpu.dot_dimension_numbers<[1], [0], [0], [1], [0, 0, 1, 1], [], []>} : vector<1x128xf32>, vector<128x196xf32>, vector<1x196xf32> -> vector<1x196xf32>
    %119 = vector.extract_strided_slice %35 {offsets = [1, 0], sizes = [4, 128], strides = [1, 1]} : vector<5x128xf32> to vector<4x128xf32>
    %c128_93 = arith.constant 128 : index
    %c0_94 = arith.constant 0 : index
    %120 = vector.load %arg11[%c128_93, %c0_94] : memref<256x196xf32, #tpu.memory_space<vmem>>, vector<128x196xf32>
    %cst_95 = arith.constant dense<0.000000e+00> : vector<4x196xf32>
    %121 = tpu.matmul %119, %120, %cst_95 {dimension_numbers = #tpu.dot_dimension_numbers<[1], [0], [0], [1], [0, 0, 1, 1], [], []>} : vector<4x128xf32>, vector<128x196xf32>, vector<4x196xf32> -> vector<4x196xf32>
    %c0_96 = arith.constant 0 : index
    %c0_97 = arith.constant 0 : index
    %122 = vector.load %arg7[%c0_96, %c0_97] : memref<4x1xf32, #tpu.memory_space<vmem>>, vector<4x1xf32>
    %123 = vector.broadcast %122 : vector<4x1xf32> to vector<4x196xf32>
    %124 = arith.addf %121, %123 : vector<4x196xf32>
    %c0_98 = arith.constant 0 : index
    %c0_99 = arith.constant 0 : index
    %c0_100 = arith.constant 0 : index
    %125 = vector.load %arg9[%c0_98, %c0_99, %c0_100] : memref<1x5x196xf32, #tpu.memory_space<vmem>>, vector<1x1x196xf32>
    %126 = vector.shape_cast %125 : vector<1x1x196xf32> to vector<1x196xf32>
    %127 = vector.shape_cast %118 : vector<1x196xf32> to vector<1x1x196xf32>
    tpu.vector_store %arg9[%c0_98, %c0_99, %c0_100], %127 {strides = array<i32>} : memref<1x5x196xf32, #tpu.memory_space<vmem>>, vector<1x1x196xf32>,
    %c0_101 = arith.constant 0 : index
    %c1_102 = arith.constant 1 : index
    %c0_103 = arith.constant 0 : index
    %128 = vector.load %arg9[%c0_101, %c1_102, %c0_103] : memref<1x5x196xf32, #tpu.memory_space<vmem>>, vector<1x4x196xf32>
    %129 = vector.shape_cast %128 : vector<1x4x196xf32> to vector<4x196xf32>
    %130 = vector.shape_cast %124 : vector<4x196xf32> to vector<1x4x196xf32>
    tpu.vector_store %arg9[%c0_101, %c1_102, %c0_103], %130 {strides = array<i32>} : memref<1x5x196xf32, #tpu.memory_space<vmem>>, vector<1x4x196xf32>,
    return
  }
  func.func @transform_0(%arg0: i32) -> (i32, i32, i32) {
    %c0_i32 = arith.constant 0 : i32
    %c0_i32_0 = arith.constant 0 : i32
    %c0_i32_1 = arith.constant 0 : i32
    return %arg0, %c0_i32, %c0_i32_0 : i32, i32, i32
  }
  func.func @transform_1(%arg0: i32) -> (i32, i32, i32) {
    %c0_i32 = arith.constant 0 : i32
    %c0_i32_0 = arith.constant 0 : i32
    %c0_i32_1 = arith.constant 0 : i32
    return %arg0, %c0_i32, %c0_i32_0 : i32, i32, i32
  }
  func.func @transform_2(%arg0: i32) -> (i32, i32) {
    %c0_i32 = arith.constant 0 : i32
    %c0_i32_0 = arith.constant 0 : i32
    %c0_i32_1 = arith.constant 0 : i32
    return %c0_i32, %c0_i32_0 : i32, i32
  }
  func.func @transform_3(%arg0: i32) -> (i32, i32) {
    %c0_i32 = arith.constant 0 : i32
    %c0_i32_0 = arith.constant 0 : i32
    %c0_i32_1 = arith.constant 0 : i32
    return %c0_i32, %c0_i32_0 : i32, i32
  }
  func.func @transform_4(%arg0: i32) -> (i32, i32) {
    %c0_i32 = arith.constant 0 : i32
    %c0_i32_0 = arith.constant 0 : i32
    %c0_i32_1 = arith.constant 0 : i32
    return %c0_i32, %c0_i32_0 : i32, i32
  }
  func.func @transform_5(%arg0: i32) -> (i32, i32) {
    %c0_i32 = arith.constant 0 : i32
    %c0_i32_0 = arith.constant 0 : i32
    %c0_i32_1 = arith.constant 0 : i32
    return %c0_i32, %c0_i32_0 : i32, i32
  }
  func.func @transform_6(%arg0: i32) -> (i32, i32) {
    %c0_i32 = arith.constant 0 : i32
    %c0_i32_0 = arith.constant 0 : i32
    %c0_i32_1 = arith.constant 0 : i32
    return %c0_i32, %c0_i32_0 : i32, i32
  }
  func.func @transform_7(%arg0: i32) -> (i32, i32) {
    %c0_i32 = arith.constant 0 : i32
    %c0_i32_0 = arith.constant 0 : i32
    %c0_i32_1 = arith.constant 0 : i32
    return %c0_i32, %c0_i32_0 : i32, i32
  }
  func.func @transform_8(%arg0: i32) -> (i32, i32, i32) {
    %c0_i32 = arith.constant 0 : i32
    %c0_i32_0 = arith.constant 0 : i32
    %c0_i32_1 = arith.constant 0 : i32
    return %arg0, %c0_i32, %c0_i32_0 : i32, i32, i32
  }
}

</mosaic_0001>

<bundles_post_ra>
// kernel: up_channel_siamese_forward.1
= control target key start
LH: loop header
LB: loop body
LE: loop exit
PB: predicated region body
PF: predicated region fallthrough
CT: control target
= control target key end

     0   :  { %s1709_s27 = smov 0   ;;  %s2063_s0 = inlined_call_operand.vmem [shape: f32[2,72,16], index: 0, kind: input, shape index: {}]   ;;  %s2064_s1 = inlined_call_operand.vmem [shape: f32[2,72,196], index: 1, kind: input, shape index: {}]   ;;  %s2065_s2 = inlined_call_operand.vmem [shape: f32[40,72], index: 2, kind: input, shape index: {}]   ;;  %s2066_s3 = inlined_call_operand.vmem [shape: f32[16,72], index: 3, kind: input, shape index: {}]   ;;  %s2067_s4 = inlined_call_operand.vmem [shape: f32[40,1], index: 4, kind: input, shape index: {}]   ;;  %s2068_s5 = inlined_call_operand.vmem [shape: f32[16,1], index: 5, kind: input, shape index: {}]   ;;  %s2069_s6 = inlined_call_operand.vmem [shape: f32[4,1], index: 6, kind: input, shape index: {}]   ;;  %s2070_s7 = inlined_call_operand.vmem [shape: f32[128,128], index: 7, kind: input, shape index: {}]   ;;  %s2071_s8 = inlined_call_operand.vmem [shape: f32[2,5,196], index: 8, kind: output, shape index: {}]  }
   0x1 LB: > { %s1476_s28 = sadd.s32 4294967295, %s1637_s27   ;;  %p1480_p0 = scmp.ge.s32.totalorder %s1637_s27, 1  ;;  %s1637_s27 = sphi %s1709_s27, %s18_s27  }
   0x2   : > { %p272_p1 = scmp.lt.s32.totalorder %s1637_s27, 3 }
   0x4   : > { %p273_p2 = pnand %p1480_p0, %p272_p1 }
   0x5   : > { %p311_p3 = scmp.lt.s32.totalorder (!%p273_p2), %s1476_s28, 1  ;;  %s1642_s17 = smov (!%p273_p2), 16  }
   0x6   : > { %276 = sbr.rel (%p273_p2) target bundleno = 849 (0x351), region = 52  ;;  %s1643_s20 = smov (!%p273_p2), 32  }
   0x7   : > { %s1644_s25 = smov (!%p273_p2), 48   ;;  %s1645_s10 = smov (!%p273_p2), 64  }
   0x8   : > { %s1646_s13 = smov (!%p273_p2), 80   ;;  %s1647_s14 = smov (!%p273_p2), 96  }
   0x9   : > { %s1649_s22 = smov (!%p273_p2), 83   ;;  %s1650_s23 = smov (!%p273_p2), 84  }
   0xa   : > { %s1653_s26 = smov (!%p273_p2), 97   ;;  %s1654_s29 = smov (!%p273_p2), 98  }
   0xb   : > { %v1639_v0 = vmov 0.0   ;;  %s2073_s28 = smov (!%p311_p3, %s1476_s28), 1  ;;  %v1640_v1 = vmov 0   ;;  %v464_v2 = vld [vmem:[%s2067_s4] sm:$0xff]  ;;  %v466_v3 = vld [vmem:[%s2067_s4 + $0x10] sm:$0xff]  ;;  %vm1641_vm0 = vmmov 0  }
   0xc   : > { %429 = vmatprep.mubr.f32.mxu1 %v1639_v0  ;;  %1559 = vmatprep.subr.mxu0 %v1639_v0  ;;  %s1595_s11 = smul.u32 144, %s2073_s28  ;;  %v465_v4 = vld [vmem:[%s2067_s4 + $0x8] sm:$0xff]  ;;  %v467_v5 = vld [vmem:[%s2067_s4 + $0x18] sm:$0xff]  ;;  %v468_v10 = vld [vmem:[%s2067_s4 + $0x20] sm:$0xff]  ;;  %vm358_vm1 = vcmask 588800   ;;  %vm599_vm2 = vcmask 126976  }
   0xd   : > { %1629 = vset.pattern.permute.xlu0 %v1640_v1  ;;  %1630 = vset.pattern.permute.xlu1 %v1640_v1  ;;  %s1594_s21 = smul.u32 72, %s2073_s28  ;;  %v326_v25 = vld [vmem:[%s2066_s3] sm:$0xff]  ;;  %v327_v28 = vld [vmem:[%s2066_s3 + $0x8] sm:$0xff]  ;;  %v452_v38 = vld [vmem:[%s2065_s2 + $0x10] sm:$0xff]  ;;  %vm609_vm3 = vcmask 261253   ;;  %vm611_vm4 = vcmask 255104  }
   0xe   : > { %471 = vperm.xlu0 %1629, %v464_v2   ;;  %1591 = vmatprep.mubr.msk.f32.mxu0 %vm1641_vm0, %v1639_v0  ;;  %s1739_s18 = scalar_lea.vmem %s2064_s1, %s1595_s11  ;;  %v450_v36 = vld [vmem:[%s2065_s2] sm:$0xff]  ;;  %v451_v37 = vld [vmem:[%s2065_s2 + $0x8] sm:$0xff]  ;;  %v453_v39 = vld [vmem:[%s2065_s2 + $0x18] sm:$0xff]  ;;  %vm616_vm5 = vcmask 391426   ;;  %vm625_vm6 = vcmask 523655   ;;  %vm627_vm7 = vcmask 519552  }
   0xf   : > { %481 = vperm.xlu1 %1630, %v466_v3   ;;  %v345_v6 = vld [vmem:[%s1739_s18 + $0x88] sm:$0xff]  ;;  %v344_v7 = vld [vmem:[%s1739_s18 + $0x80] sm:$0xff]  ;;  %v343_v8 = vld [vmem:[%s1739_s18 + $0x78] sm:$0xff]  ;;  %s1765_s24 = scalar_lea.vmem %s2063_s0, %s1594_s21  ;;  %vm636_vm8 = vcmask 654852   ;;  %vm638_vm9 = vcmask 647680   ;;  %vm643_vm10 = vcmask 784001  }
  0x10   : > { %379 = vmatprep.subr.mxu1 %v345_v6  ;;  %v342_v9 = vld [vmem:[%s1739_s18 + $0x70] sm:$0xff]  ;;  %v341_v11 = vld [vmem:[%s1739_s18 + $0x68] sm:$0xff]  ;;  %v340_v12 = vld [vmem:[%s1739_s18 + $0x60] sm:$0xff]  ;;  %vm652_vm11 = vcmask 917254   ;;  %vm654_vm12 = vcmask 912128   ;;  %vm659_vm13 = vcmask 1048451  }
  0x11   : > { %380 = vmatpush1.msra.mxu1 %v344_v7  ;;  %v339_v13 = vld [vmem:[%s1739_s18 + $0x58] sm:$0xff]  ;;  %v338_v14 = vld [vmem:[%s1739_s18 + $0x50] sm:$0xff]  ;;  %v337_v15 = vld [vmem:[%s1739_s18 + $0x48] sm:$0xff]  ;;  %vm443_vm14 = vcmask 556032   ;;  %vm447_vm15 = vcmask 925216   ;;  %s1655_s30 = smov 99  }
  0x12   : > { %476 = vperm.xlu0 %1629, %v465_v4   ;;  %381 = vmatprep.subr.mxu1 %v343_v8  ;;  %v336_v16 = vld [vmem:[%s1739_s18 + $0x40] sm:$0xff]  ;;  %v335_v17 = vld [vmem:[%s1739_s18 + $0x38] sm:$0xff]  ;;  %v334_v18 = vld [vmem:[%s1739_s18 + $0x30] sm:$0xff]  ;;  %s1656_s9 = smov 100   ;;  %s1658_s11 = smov 113  }
  0x13   : > { %486 = vperm.xlu1 %1630, %v467_v5   ;;  %382 = vmatpush1.msra.mxu1 %v342_v9  ;;  %v333_v19 = vld [vmem:[%s1739_s18 + $0x28] sm:$0xff]  ;;  %v332_v20 = vld [vmem:[%s1739_s18 + $0x20] sm:$0xff]  ;;  %v331_v21 = vld [vmem:[%s1739_s18 + $0x18] sm:$0xff]  ;;  %s1659_s12 = smov 114   ;;  %s1662_s15 = smov 127  }
  0x14   : > { %383 = vmatprep.subr.mxu1 %v341_v11  ;;  %v330_v22 = vld [vmem:[%s1739_s18 + $0x10] sm:$0xff]  ;;  %v329_v23 = vld [vmem:[%s1739_s18 + $0x8] sm:$0xff]  ;;  %v328_v24 = vld [vmem:[%s1739_s18] sm:$0xff]  ;;  %s1494_s18 = sshll.u32 %s2073_s28, 4 }
  0x15   : > { %384 = vmatpush1.msra.mxu1 %v340_v12  ;;  %v463_v26 = vld [vmem:[%s1765_s24 + $0x40] sm:$0xff]  ;;  %v462_v27 = vld [vmem:[%s1765_s24 + $0x38] sm:$0xff]  ;;  %v461_v29 = vld [vmem:[%s1765_s24 + $0x30] sm:$0xff]  ;;  %s325_s21 = scalar_lea.vmem %s2071_s8, %s1494_s18 }
  0x16   : > { %491 = vperm.xlu0 %1629, %v468_v10   ;;  %385 = vmatprep.subr.mxu1 %v339_v13  ;;  %v460_v30 = vld [vmem:[%s1765_s24 + $0x28] sm:$0xff]  ;;  %v459_v31 = vld [vmem:[%s1765_s24 + $0x20] sm:$0xff]  ;;  %v458_v32 = vld [vmem:[%s1765_s24 + $0x18] sm:$0xff] }
  0x17   : > { %386 = vmatpush1.msra.mxu1 %v338_v14  ;;  %v457_v33 = vld [vmem:[%s1765_s24 + $0x10] sm:$0xff]  ;;  %v456_v34 = vld [vmem:[%s1765_s24 + $0x8] sm:$0xff]  ;;  %v455_v35 = vld [vmem:[%s1765_s24] sm:$0xff]  ;;  %s1651_s24 = smov 85  }
  0x18   : > { %387 = vmatprep.subr.mxu1 %v337_v15  ;;  %v454_v40 = vld [vmem:[%s2065_s2 + $0x20] sm:$0xff]  ;;  %v677_v41 = vld [vmem:[%s2070_s7 + $0x78] sm:$0xff]  ;;  %v676_v43 = vld [vmem:[%s2070_s7 + $0x70] sm:$0xff] }
  0x19   : > { %388 = vmatpush1.msra.mxu1 %v336_v16  ;;  %1560 = vmatpush3.msra.mxu0 %v677_v41  ;;  %v675_v44 = vld [vmem:[%s2070_s7 + $0x68] sm:$0xff]  ;;  %v674_v46 = vld [vmem:[%s2070_s7 + $0x60] sm:$0xff]  ;;  %v673_v48 = vld [vmem:[%s2070_s7 + $0x58] sm:$0xff] }
  0x1a   : > { %389 = vmatprep.subr.mxu1 %v335_v17  ;;  %1561 = vmatprep.subr.mxu0 %v1639_v0  ;;  %v672_v49 = vld [vmem:[%s2070_s7 + $0x50] sm:$0xff]  ;;  %v671_v52 = vld [vmem:[%s2070_s7 + $0x48] sm:$0xff]  ;;  %v670_v55 = vld [vmem:[%s2070_s7 + $0x40] sm:$0xff] }
  0x1b   : > { %390 = vmatpush1.msra.mxu1 %v334_v18  ;;  %1562 = vmatpush3.msra.mxu0 %v676_v43  ;;  %v669_v57 = vld [vmem:[%s2070_s7 + $0x38] sm:$0xff]  ;;  %v668_v62 = vld [vmem:[%s2070_s7 + $0x30] sm:$0xff]  ;;  %v667_v1 = vld [vmem:[%s2070_s7 + $0x28] sm:$0xff] }
  0x1c   : > { %391 = vmatprep.subr.mxu1 %v333_v19  ;;  %1563 = vmatprep.subr.mxu0 %v1639_v0  ;;  %v666_v4 = vld [vmem:[%s2070_s7 + $0x20] sm:$0xff]  ;;  %v665_v7 = vld [vmem:[%s2070_s7 + $0x18] sm:$0xff]  ;;  %v664_v11 = vld [vmem:[%s2070_s7 + $0x10] sm:$0xff] }
  0x1d   : > { %392 = vmatpush1.msra.mxu1 %v332_v20  ;;  %1564 = vmatpush3.msra.mxu0 %v675_v44  ;;  %v663_v13 = vld [vmem:[%s2070_s7 + $0x8] sm:$0xff]  ;;  %v662_v15 = vld [vmem:[%s2070_s7] sm:$0xff] }
  0x1e   : > { %393 = vmatprep.subr.mxu1 %v331_v21  ;;  %1565 = vmatprep.subr.mxu0 %v1639_v0  ;;  %v347_v18 = vld [vmem:[%s2068_s5 + $0x8] sm:$0xff]  ;;  %v346_v19 = vld [vmem:[%s2068_s5] sm:$0xff] }
  0x1f   : > { %394 = vmatpush1.msra.mxu1 %v330_v22  ;;  %1566 = vmatpush3.msra.mxu0 %v674_v46 }
  0x20   : > { %395 = vmatprep.subr.mxu1 %v329_v23  ;;  %1567 = vmatprep.subr.mxu0 %v1639_v0 }
  0x21   : > { %396 = vmatpush1.msra.mxu1 %v328_v24  ;;  %1568 = vmatpush3.msra.mxu0 %v673_v48 }
  0x22   : > { %1485 = vmatmul.mubr.msk.f32.vlgmr.msra.gmra.mxu1 %vm358_vm1, %v326_v25  ;;  %1526 = vmatprep.subr.mxu1 %v1639_v0 }
  0x23   : > { %1527 = vmatpush3.msra.mxu1 %v463_v26  ;;  %435 = vmatprep.mubr.f32.mxu1 %v1639_v0 }
  0x24   : > { %1528 = vmatprep.subr.mxu1 %v1639_v0  ;;  %1569 = vmatprep.subr.mxu0 %v1639_v0 }
  0x25   : > { %1529 = vmatpush3.msra.mxu1 %v462_v27  ;;  %1570 = vmatpush3.msra.mxu0 %v672_v49 }
  0x26   : > { %1530 = vmatprep.subr.mxu1 %v1639_v0  ;;  %1486 = vmatmul.mubr.msk.f32.gmra.mxu1 %vm358_vm1, %v327_v28 }
  0x27   : > { %1531 = vmatpush3.msra.mxu1 %v461_v29  ;;  %1544 = vmatprep.mubr.msk.f32.mxu1 %vm1641_vm0, %v1639_v0 }
  0x28   : > { %1532 = vmatprep.subr.mxu1 %v1639_v0  ;;  %1571 = vmatprep.subr.mxu0 %v1639_v0 }
  0x29   : > { %1533 = vmatpush3.msra.mxu1 %v460_v30  ;;  %1572 = vmatpush3.msra.mxu0 %v671_v52 }
  0x2a   : > { %1534 = vmatprep.subr.mxu1 %v1639_v0  ;;  %1573 = vmatprep.subr.mxu0 %v1639_v0 }
  0x2b   : > { %1535 = vmatpush3.msra.mxu1 %v459_v31  ;;  %1574 = vmatpush3.msra.mxu0 %v670_v55 }
  0x2c   : > { %1536 = vmatprep.subr.mxu1 %v1639_v0  ;;  %1575 = vmatprep.subr.mxu0 %v1639_v0 }
  0x2d   : > { %1537 = vmatpush3.msra.mxu1 %v458_v32  ;;  %1576 = vmatpush3.msra.mxu0 %v669_v57 }
  0x2e   : > { %1538 = vmatprep.subr.mxu1 %v1639_v0  ;;  %1577 = vmatprep.subr.mxu0 %v1639_v0 }
  0x2f   : > { %1539 = vmatpush3.msra.mxu1 %v457_v33  ;;  %1578 = vmatpush3.msra.mxu0 %v668_v62 }
  0x30   : > { %1540 = vmatprep.subr.mxu1 %v1639_v0  ;;  %1579 = vmatprep.subr.mxu0 %v1639_v0 }
  0x31   : > { %1541 = vmatpush3.msra.mxu1 %v456_v34  ;;  %1580 = vmatpush3.msra.mxu0 %v667_v1 }
  0x32   : > { %1542 = vmatprep.subr.mxu1 %v1639_v0  ;;  %1581 = vmatprep.subr.mxu0 %v1639_v0 }
  0x33   : > { %1543 = vmatpush3.msra.mxu1 %v455_v35  ;;  %1582 = vmatpush3.msra.mxu0 %v666_v4 }
  0x34   : > { %1545 = vmatmul.mubr.msk.f32.vlgmr.msra.gmra.mxu1 %vm358_vm1, %v450_v36  ;;  %1583 = vmatprep.subr.mxu0 %v1639_v0 }
  0x35   : > { %1547 = vmatprep.mubr.msk.f32.mxu1 %vm1641_vm0, %v1639_v0  ;;  %1584 = vmatpush3.msra.mxu0 %v665_v7 }
  0x36   : > { %1585 = vmatprep.subr.mxu0 %v1639_v0 }
  0x37   : > { %1586 = vmatpush3.msra.mxu0 %v664_v11 }
  0x38   : > { %1548 = vmatmul.mubr.msk.f32.gmra.mxu1 %vm358_vm1, %v451_v37  ;;  %1587 = vmatprep.subr.mxu0 %v1639_v0 }
  0x39   : > { %1550 = vmatprep.mubr.msk.f32.mxu1 %vm1641_vm0, %v1639_v0  ;;  %1588 = vmatpush3.msra.mxu0 %v663_v13 }
  0x3a   : > { %1589 = vmatprep.subr.mxu0 %v1639_v0 }
  0x3b   : > { %1590 = vmatpush3.msra.mxu0 %v662_v15 }
  0x3c   : > { %1551 = vmatmul.mubr.msk.f32.gmra.mxu1 %vm358_vm1, %v452_v38 }
  0x3d   : > { %1553 = vmatprep.mubr.msk.f32.mxu1 %vm1641_vm0, %v1639_v0 }
  0x40   : > { %1554 = vmatmul.mubr.msk.f32.gmra.mxu1 %vm358_vm1, %v453_v39 }
  0x41   : > { %1556 = vmatprep.mubr.msk.f32.mxu1 %vm1641_vm0, %v1639_v0  ;;  %vm1144_vm0 = vcmask 678912  }
  0x44   : > { %1557 = vmatmul.mubr.msk.f32.gmra.mxu1 %vm358_vm1, %v454_v40  ;;  %v1296_v40 = vld [vmem:[%s2069_s6] sm:$0xf]  ;;  %vm1117_vm1 = vcmask 687104  }
  0x45   : > { %1257 = vmatprep.mubr.f32.mxu1 %v1639_v0 }
  0x89   : > { %v472_v50 = vpop.permute.xlu0 %471 }
  0x8a   : > { %v482_v58 = vpop.permute.xlu1 %481 }
  0x8d   : > { %v477_v59 = vpop.permute.xlu0 %476 }
  0x8e   : > { %v487_v6 = vpop.permute.xlu1 %486 }
  0x91   : > { %v492_v16 = vpop.permute.xlu0 %491 }
  0xe2   : > { %v1830_v42 = vpop.f32.mrf.mxu1 }
  0xe4   : > { %v1839_v45 = vpop.f32.mrf.mxu1 }
  0xe6   : > { %v1845_v47 = vpop.f32.mrf.mxu1 }
  0xe8   : > { %v1855_v51 = vpop.f32.mrf.mxu1 }
  0xf4   : > { %v575_v53 = vpop.f32.mrf.mxu1 }
  0xf5   : > { %v576_v54 = vadd.f32 %v575_v53, %v472_v50 }
  0xf6   : > { %v1546_v56 = vpop.f32.mrf.mxu1 }
  0xf7   : > { %600 = vst.msk [vmem:[#allocation4] sm:$0x1f] %vm599_vm2, %v576_v54  ;;  %603 = vrot.lane.b32.xlu1 %v576_v54, %s1642_s17  ;;  %vm1090_vm2 = vcmask 695296  }
  0xf8   : > { %v580_v60 = vpop.f32.mrf.mxu1 }
  0xf9   : > { %v581_v61 = vadd.f32 %v580_v60, %v477_v59 }
  0xfa   : > { %v1549_v63 = vpop.f32.mrf.mxu1 }
  0xfb   : > { %613 = vrot.lane.b32.xlu1 %v581_v61, %s1643_s20  ;;  %605 = vrot.lane.b32.xlu0 %v581_v61, %s1642_s17  ;;  %s1648_s17 = smov 112  }
  0xfc   : > { %v585_v2 = vpop.f32.mrf.mxu1 }
  0xfd   : > { %v586_v3 = vadd.f32 %v585_v2, %v482_v58 }
  0xfe   : > { %v1552_v5 = vpop.f32.mrf.mxu1 }
  0xff   : > { %619 = vrot.lane.b32.xlu0 %v581_v61, %s1644_s25  ;;  %621 = vrot.lane.b32.xlu1 %v586_v3, %s1644_s25  ;;  %s1652_s25 = smov 86  }
 0x100   : > { %v590_v8 = vpop.f32.mrf.mxu1 }
 0x101   : > { %v591_v9 = vadd.f32 %v590_v8, %v487_v6 }
 0x102   : > { %v1555_v10 = vpop.f32.mrf.mxu1 }
 0x103   : > { %630 = vrot.lane.b32.xlu0 %v586_v3, %s1645_s10  ;;  %632 = vrot.lane.b32.xlu1 %v591_v9, %s1645_s10  ;;  %s1657_s10 = smov 111  }
 0x104   : > { %v595_v12 = vpop.f32.mrf.mxu1 }
 0x105   : > { %v596_v17 = vadd.f32 %v595_v12, %v492_v16 }
 0x106   : > { %v1558_v14 = vpop.f32.mrf.mxu1 }
 0x107   : > { %640 = vrot.lane.b32.xlu0 %v591_v9, %s1646_s13  ;;  %646 = vrot.lane.b32.xlu1 %v591_v9, %s1647_s14  ;;  %s1660_s13 = smov 125  }
 0x10b   : > { %656 = vrot.lane.b32.xlu1 %v596_v17, %s1648_s17  ;;  %648 = vrot.lane.b32.xlu0 %v596_v17, %s1647_s14  ;;  %s1661_s14 = smov 126  }
 0x10f   : > { %355 = vperm.xlu1 %1630, %v347_v18   ;;  %350 = vperm.xlu0 %1629, %v346_v19  }
 0x169   : > { %v604_v20 = vpop.permute.xlu1 %603 }
 0x16a   : > { %610 = vst.msk [vmem:[#allocation4 - $0x5] sm:$0xe0] %vm609_vm3, %v604_v20  ;;  %vm1063_vm3 = vcmask 703488  }
 0x16d   : > { %v614_v21 = vpop.permute.xlu1 %613  ;;  %v606_v22 = vpop.permute.xlu0 %605 }
 0x16e   : > { %612 = vst.msk [vmem:[#allocation4 + $0x3] sm:$0x3] %vm611_vm4, %v606_v22  ;;  %vm1036_vm4 = vcmask 793600  }
 0x16f   : > { %617 = vst.msk [vmem:[#allocation4 - $0x2] sm:$0x7c] %vm616_vm5, %v614_v21  ;;  %vm1009_vm5 = vcmask 801792  }
 0x171   : > { %v620_v23 = vpop.permute.xlu0 %619  ;;  %v622_v24 = vpop.permute.xlu1 %621 }
 0x172   : > { %626 = vst.msk [vmem:[#allocation4 - $0x7] sm:$0x80] %vm625_vm6, %v620_v23  ;;  %vm982_vm6 = vcmask 809984  }
 0x173   : > { %628 = vst.msk [vmem:[#allocation4 + $0x1] sm:$0xf] %vm627_vm7, %v622_v24  ;;  %vm955_vm7 = vcmask 818176  }
 0x175   : > { %v631_v25 = vpop.permute.xlu0 %630  ;;  %v633_v26 = vpop.permute.xlu1 %632 }
 0x176   : > { %637 = vst.msk [vmem:[#allocation4 - $0x4] sm:$0xf0] %vm636_vm8, %v631_v25  ;;  %vm928_vm8 = vcmask 908288  }
 0x177   : > { %639 = vst.msk [vmem:[#allocation4 + $0x4] sm:$0x1] %vm638_vm9, %v633_v26  ;;  %vm901_vm9 = vcmask 916480  }
 0x179   : > { %v641_v27 = vpop.permute.xlu0 %640  ;;  %v647_v28 = vpop.permute.xlu1 %646 }
 0x17a   : > { %644 = vst.msk [vmem:[#allocation4 - $0x1] sm:$0x3e] %vm643_vm10, %v641_v27  ;;  %vm874_vm10 = vcmask 924672  }
 0x17b   : > { %653 = vst.msk [vmem:[#allocation4 - $0x6] sm:$0xc0] %vm652_vm11, %v647_v28  ;;  %vm847_vm11 = vcmask 932864  }
 0x17d   : > { %v657_v29 = vpop.permute.xlu1 %656  ;;  %v649_v30 = vpop.permute.xlu0 %648 }
 0x17e   : > { %655 = vst.msk [vmem:[#allocation4 + $0x2] sm:$0x7] %vm654_vm12, %v649_v30  ;;  %vm820_vm12 = vcmask 1022976  }
 0x17f   : > { %660 = vst.msk [vmem:[#allocation4 - $0x3] sm:$0xf8] %vm659_vm13, %v657_v29  ;;  %vm793_vm13 = vcmask 1031168  }
 0x186   : > { %v661_v31 = vld [vmem:[#allocation4] sm:$0x1f] }
 0x187   : > { %1592 = vmatmul.mubr.f32.vlgmr.msra.gmra.mxu0 %v661_v31 }
 0x188   : > { %1369 = vmatprep.mubr.f32.mxu0 %v1639_v0 }
 0x18a   : > { %v356_v32 = vpop.permute.xlu1 %355  ;;  %v351_v33 = vpop.permute.xlu0 %350 }
 0x18b   : > { %v1906_v34 = vadd.f32 %v1845_v47, %v356_v32  ;;  %v440_v35 = vadd.f32 %v1855_v51, %v356_v32  ;;  %v1910_v36 = vadd.f32 %v1830_v42, %v351_v33  ;;  %v434_v37 = vadd.f32 %v1839_v45, %v351_v33 }
 0x18d   : > { %446 = vst.msk [vmem:[#allocation2 + $0x18] sm:$0xff] %vm443_vm14, %v440_v35  ;;  %444 = vst.msk [vmem:[#allocation2 + $0x8] sm:$0xff] %vm443_vm14, %v434_v37  ;;  %1140 = vrot.lane.b32.xlu0 %v1910_v36, %s1649_s22 }
 0x18e   : > { %449 = vst.msk [vmem:[#allocation2 + $0x18] sm:$0xff] %vm447_vm15, %v1639_v0  ;;  %448 = vst.msk [vmem:[#allocation2 + $0x8] sm:$0xff] %vm447_vm15, %v1639_v0  ;;  %vm766_vm15 = vcmask 1039360  }
 0x191   : > { %1113 = vrot.lane.b32.xlu0 %v1910_v36, %s1650_s23 }
 0x195   : > { %v1919_v38 = vld [vmem:[#allocation2 + $0x8] sm:$0xff]  ;;  %1152 = vrot.lane.b32.xlu0 %v1906_v34, %s1649_s22  ;;  %v1922_v39 = vld [vmem:[#allocation2 + $0x18] sm:$0xff] }
 0x196   : > { %1142 = vrot.lane.b32.xlu1 %v1919_v38, %s1649_s22  ;;  %753 = vst.msk [vmem:[#allocation3 + $0x8] sm:$0xff] %vm443_vm14, %v1919_v38  ;;  %755 = vst.msk [vmem:[#allocation3 + $0x108] sm:$0xff] %vm443_vm14, %v1922_v39 }
 0x199   : > { %1086 = vrot.lane.b32.xlu0 %v1910_v36, %s1651_s24 }
 0x19a   : > { %1115 = vrot.lane.b32.xlu1 %v1919_v38, %s1650_s23 }
 0x19d   : > { %1125 = vrot.lane.b32.xlu0 %v1906_v34, %s1650_s23 }
 0x19e   : > { %1154 = vrot.lane.b32.xlu1 %v1922_v39, %s1649_s22 }
 0x1a1   : > { %1059 = vrot.lane.b32.xlu0 %v1910_v36, %s1652_s25 }
 0x1a2   : > { %1088 = vrot.lane.b32.xlu1 %v1919_v38, %s1651_s24 }
 0x1a5   : > { %1098 = vrot.lane.b32.xlu0 %v1906_v34, %s1651_s24 }
 0x1a6   : > { %1127 = vrot.lane.b32.xlu1 %v1922_v39, %s1650_s23 }
 0x1a9   : > { %1032 = vrot.lane.b32.xlu0 %v1910_v36, %s1653_s26 }
 0x1aa   : > { %1061 = vrot.lane.b32.xlu1 %v1919_v38, %s1652_s25 }
 0x1ad   : > { %1071 = vrot.lane.b32.xlu0 %v1906_v34, %s1652_s25 }
 0x1ae   : > { %1100 = vrot.lane.b32.xlu1 %v1922_v39, %s1651_s24 }
 0x1b1   : > { %1005 = vrot.lane.b32.xlu0 %v1910_v36, %s1654_s29 }
 0x1b2   : > { %1034 = vrot.lane.b32.xlu1 %v1919_v38, %s1653_s26 }
 0x1b5   : > { %1044 = vrot.lane.b32.xlu0 %v1906_v34, %s1653_s26 }
 0x1b6   : > { %1073 = vrot.lane.b32.xlu1 %v1922_v39, %s1652_s25 }
 0x1b9   : > { %978 = vrot.lane.b32.xlu0 %v1910_v36, %s1655_s30 }
 0x1ba   : > { %1007 = vrot.lane.b32.xlu1 %v1919_v38, %s1654_s29 }
 0x1bd   : > { %1017 = vrot.lane.b32.xlu0 %v1906_v34, %s1654_s29 }
 0x1be   : > { %1046 = vrot.lane.b32.xlu1 %v1922_v39, %s1653_s26 }
 0x1c1   : > { %951 = vrot.lane.b32.xlu0 %v1910_v36, %s1656_s9 }
 0x1c2   : > { %980 = vrot.lane.b32.xlu1 %v1919_v38, %s1655_s30 }
 0x1c5   : > { %990 = vrot.lane.b32.xlu0 %v1906_v34, %s1655_s30 }
 0x1c6   : > { %1019 = vrot.lane.b32.xlu1 %v1922_v39, %s1654_s29 }
 0x1c9   : > { %924 = vrot.lane.b32.xlu0 %v1910_v36, %s1657_s10 }
 0x1ca   : > { %953 = vrot.lane.b32.xlu1 %v1919_v38, %s1656_s9 }
 0x1cd   : > { %963 = vrot.lane.b32.xlu0 %v1906_v34, %s1656_s9 }
 0x1ce   : > { %992 = vrot.lane.b32.xlu1 %v1922_v39, %s1655_s30 }
 0x1d1   : > { %897 = vrot.lane.b32.xlu0 %v1910_v36, %s1648_s17 }
 0x1d2   : > { %926 = vrot.lane.b32.xlu1 %v1919_v38, %s1657_s10 }
 0x1d5   : > { %936 = vrot.lane.b32.xlu0 %v1906_v34, %s1657_s10 }
 0x1d6   : > { %965 = vrot.lane.b32.xlu1 %v1922_v39, %s1656_s9 }
 0x1d9   : > { %870 = vrot.lane.b32.xlu0 %v1910_v36, %s1658_s11 }
 0x1da   : > { %899 = vrot.lane.b32.xlu1 %v1919_v38, %s1648_s17 }
 0x1dd   : > { %909 = vrot.lane.b32.xlu0 %v1906_v34, %s1648_s17 }
 0x1de   : > { %938 = vrot.lane.b32.xlu1 %v1922_v39, %s1657_s10 }
 0x1e1   : > { %843 = vrot.lane.b32.xlu0 %v1910_v36, %s1659_s12 }
 0x1e2   : > { %872 = vrot.lane.b32.xlu1 %v1919_v38, %s1658_s11 }
 0x1e5   : > { %882 = vrot.lane.b32.xlu0 %v1906_v34, %s1658_s11 }
 0x1e6   : > { %911 = vrot.lane.b32.xlu1 %v1922_v39, %s1648_s17 }
 0x1e9   : > { %816 = vrot.lane.b32.xlu0 %v1910_v36, %s1660_s13 }
 0x1ea   : > { %845 = vrot.lane.b32.xlu1 %v1919_v38, %s1659_s12 }
 0x1ed   : > { %855 = vrot.lane.b32.xlu0 %v1906_v34, %s1659_s12 }
 0x1ee   : > { %884 = vrot.lane.b32.xlu1 %v1922_v39, %s1658_s11 }
 0x1f1   : > { %789 = vrot.lane.b32.xlu0 %v1910_v36, %s1661_s14 }
 0x1f2   : > { %818 = vrot.lane.b32.xlu1 %v1919_v38, %s1660_s13 }
 0x1f5   : > { %828 = vrot.lane.b32.xlu0 %v1906_v34, %s1660_s13 }
 0x1f6   : > { %857 = vrot.lane.b32.xlu1 %v1922_v39, %s1659_s12 }
 0x1f9   : > { %762 = vrot.lane.b32.xlu0 %v1910_v36, %s1662_s15 }
 0x1fa   : > { %791 = vrot.lane.b32.xlu1 %v1919_v38, %s1661_s14 }
 0x1fd   : > { %801 = vrot.lane.b32.xlu0 %v1906_v34, %s1661_s14 }
 0x1fe   : > { %830 = vrot.lane.b32.xlu1 %v1922_v39, %s1660_s13 }
 0x1ff   : > { %v1141_v0 = vpop.permute.xlu0 %1140 }
 0x201   : > { %774 = vrot.lane.b32.xlu0 %v1906_v34, %s1662_s15 }
 0x202   : > { %764 = vrot.lane.b32.xlu1 %v1919_v38, %s1662_s15 }
 0x203   : > { %v1114_v41 = vpop.permute.xlu0 %1113 }
 0x205   : > { %1299 = vperm.xlu0 %1629, %v1296_v40  }
 0x206   : > { %803 = vrot.lane.b32.xlu1 %v1922_v39, %s1661_s14 }
 0x207   : > { %v1153_v42 = vpop.permute.xlu0 %1152 }
 0x208   : > { %v1143_v43 = vpop.permute.xlu1 %1142 }
 0x209   : > { %v1145_v44 = vsel %vm1144_vm0, %v1141_v0, %v1143_v43  ;;  %1149 = vst.msk [vmem:[#allocation3 + $0xf8] sm:$0xff] %vm443_vm14, %v1143_v43 }
 0x20a   : > { %776 = vrot.lane.b32.xlu1 %v1922_v39, %s1662_s15 }
 0x20b   : > { %v1087_v45 = vpop.permute.xlu0 %1086 }
 0x20c   : > { %v1116_v46 = vpop.permute.xlu1 %1115 }
 0x20d   : > { %v1118_v47 = vsel %vm1117_vm1, %v1114_v41, %v1116_v46  ;;  %1122 = vst.msk [vmem:[#allocation3 + $0xe8] sm:$0xff] %vm443_vm14, %v1116_v46 }
 0x20f   : > { %v1126_v48 = vpop.permute.xlu0 %1125 }
 0x210   : > { %v1155_v49 = vpop.permute.xlu1 %1154  ;;  %v1192_v50 = vld [vmem:[#allocation3 + $0xf8] sm:$0xff] }
 0x211   : > { %v1156_v51 = vsel %vm1144_vm0, %v1153_v42, %v1155_v49  ;;  %1160 = vst.msk [vmem:[#allocation3 + $0x1f8] sm:$0xff] %vm443_vm14, %v1155_v49  ;;  %1193 = vmatprep.subr.mxu1 %v1192_v50  ;;  %vm1407_vm0 = vcmask 552961  }
 0x212   : > { %1194 = vmatpush1.msra.mxu1 %v1145_v44 }
 0x213   : > { %v1060_v52 = vpop.permute.xlu0 %1059 }
 0x214   : > { %v1089_v53 = vpop.permute.xlu1 %1088  ;;  %v1190_v54 = vld [vmem:[#allocation3 + $0xe8] sm:$0xff] }
 0x215   : > { %v1091_v55 = vsel %vm1090_vm2, %v1087_v45, %v1089_v53  ;;  %1095 = vst.msk [vmem:[#allocation3 + $0xd8] sm:$0xff] %vm443_vm14, %v1089_v53  ;;  %1195 = vmatprep.subr.mxu1 %v1190_v54 }
 0x216   : > { %1196 = vmatpush1.msra.mxu1 %v1118_v47 }
 0x217   : > { %v1099_v56 = vpop.permute.xlu0 %1098 }
 0x218   : > { %v1128_v57 = vpop.permute.xlu1 %1127  ;;  %v1295_v58 = vld [vmem:[#allocation3 + $0x1f8] sm:$0xff] }
 0x219   : > { %v1129_v59 = vsel %vm1117_vm1, %v1126_v48, %v1128_v57  ;;  %1133 = vst.msk [vmem:[#allocation3 + $0x1e8] sm:$0xff] %vm443_vm14, %v1128_v57  ;;  %1305 = vmatprep.subr.mxu0 %v1295_v58 }
 0x21a   : > { %1306 = vmatpush1.msra.mxu0 %v1156_v51 }
 0x21b   : > { %v1033_v60 = vpop.permute.xlu0 %1032 }
 0x21c   : > { %v1062_v61 = vpop.permute.xlu1 %1061  ;;  %v1188_v62 = vld [vmem:[#allocation3 + $0xd8] sm:$0xff] }
 0x21d   : > { %v1064_v63 = vsel %vm1063_vm3, %v1060_v52, %v1062_v61  ;;  %1068 = vst.msk [vmem:[#allocation3 + $0xc8] sm:$0xff] %vm443_vm14, %v1062_v61  ;;  %1197 = vmatprep.subr.mxu1 %v1188_v62 }
 0x21e   : > { %1198 = vmatpush1.msra.mxu1 %v1091_v55 }
 0x21f   : > { %v1072_v1 = vpop.permute.xlu0 %1071 }
 0x220   : > { %v1101_v2 = vpop.permute.xlu1 %1100  ;;  %v1293_v3 = vld [vmem:[#allocation3 + $0x1e8] sm:$0xff] }
 0x221   : > { %v1102_v4 = vsel %vm1090_vm2, %v1099_v56, %v1101_v2  ;;  %1106 = vst.msk [vmem:[#allocation3 + $0x1d8] sm:$0xff] %vm443_vm14, %v1101_v2  ;;  %1307 = vmatprep.subr.mxu0 %v1293_v3 }
 0x222   : > { %1308 = vmatpush1.msra.mxu0 %v1129_v59 }
 0x223   : > { %v1006_v5 = vpop.permute.xlu0 %1005 }
 0x224   : > { %v1035_v6 = vpop.permute.xlu1 %1034  ;;  %v1186_v7 = vld [vmem:[#allocation3 + $0xc8] sm:$0xff] }
 0x225   : > { %v1037_v8 = vsel %vm1036_vm4, %v1033_v60, %v1035_v6  ;;  %1041 = vst.msk [vmem:[#allocation3 + $0xb8] sm:$0xff] %vm443_vm14, %v1035_v6  ;;  %1199 = vmatprep.subr.mxu1 %v1186_v7 }
 0x226   : > { %1200 = vmatpush1.msra.mxu1 %v1064_v63 }
 0x227   : > { %v1045_v9 = vpop.permute.xlu0 %1044 }
 0x228   : > { %v1074_v10 = vpop.permute.xlu1 %1073  ;;  %v1291_v11 = vld [vmem:[#allocation3 + $0x1d8] sm:$0xff] }
 0x229   : > { %v1075_v12 = vsel %vm1063_vm3, %v1072_v1, %v1074_v10  ;;  %1079 = vst.msk [vmem:[#allocation3 + $0x1c8] sm:$0xff] %vm443_vm14, %v1074_v10  ;;  %1309 = vmatprep.subr.mxu0 %v1291_v11 }
 0x22a   : > { %1310 = vmatpush1.msra.mxu0 %v1102_v4 }
 0x22b   : > { %v979_v13 = vpop.permute.xlu0 %978 }
 0x22c   : > { %v1008_v14 = vpop.permute.xlu1 %1007  ;;  %v1184_v15 = vld [vmem:[#allocation3 + $0xb8] sm:$0xff] }
 0x22d   : > { %v1010_v16 = vsel %vm1009_vm5, %v1006_v5, %v1008_v14  ;;  %1014 = vst.msk [vmem:[#allocation3 + $0xa8] sm:$0xff] %vm443_vm14, %v1008_v14  ;;  %1201 = vmatprep.subr.mxu1 %v1184_v15 }
 0x22e   : > { %1202 = vmatpush1.msra.mxu1 %v1037_v8 }
 0x22f   : > { %v1018_v17 = vpop.permute.xlu0 %1017 }
 0x230   : > { %v1047_v18 = vpop.permute.xlu1 %1046  ;;  %v1289_v19 = vld [vmem:[#allocation3 + $0x1c8] sm:$0xff] }
 0x231   : > { %v1048_v20 = vsel %vm1036_vm4, %v1045_v9, %v1047_v18  ;;  %1052 = vst.msk [vmem:[#allocation3 + $0x1b8] sm:$0xff] %vm443_vm14, %v1047_v18  ;;  %1311 = vmatprep.subr.mxu0 %v1289_v19 }
 0x232   : > { %1312 = vmatpush1.msra.mxu0 %v1075_v12 }
 0x233   : > { %v952_v21 = vpop.permute.xlu0 %951 }
 0x234   : > { %v981_v22 = vpop.permute.xlu1 %980  ;;  %v1182_v23 = vld [vmem:[#allocation3 + $0xa8] sm:$0xff] }
 0x235   : > { %v983_v24 = vsel %vm982_vm6, %v979_v13, %v981_v22  ;;  %987 = vst.msk [vmem:[#allocation3 + $0x98] sm:$0xff] %vm443_vm14, %v981_v22  ;;  %1203 = vmatprep.subr.mxu1 %v1182_v23 }
 0x236   : > { %1204 = vmatpush1.msra.mxu1 %v1010_v16 }
 0x237   : > { %v991_v25 = vpop.permute.xlu0 %990 }
 0x238   : > { %v1020_v26 = vpop.permute.xlu1 %1019  ;;  %v1287_v27 = vld [vmem:[#allocation3 + $0x1b8] sm:$0xff] }
 0x239   : > { %v1021_v28 = vsel %vm1009_vm5, %v1018_v17, %v1020_v26  ;;  %1025 = vst.msk [vmem:[#allocation3 + $0x1a8] sm:$0xff] %vm443_vm14, %v1020_v26  ;;  %1313 = vmatprep.subr.mxu0 %v1287_v27 }
 0x23a   : > { %1314 = vmatpush1.msra.mxu0 %v1048_v20 }
 0x23b   : > { %v925_v29 = vpop.permute.xlu0 %924 }
 0x23c   : > { %v954_v30 = vpop.permute.xlu1 %953  ;;  %v1180_v31 = vld [vmem:[#allocation3 + $0x98] sm:$0xff] }
 0x23d   : > { %v956_v32 = vsel %vm955_vm7, %v952_v21, %v954_v30  ;;  %960 = vst.msk [vmem:[#allocation3 + $0x88] sm:$0xff] %vm443_vm14, %v954_v30  ;;  %1205 = vmatprep.subr.mxu1 %v1180_v31 }
 0x23e   : > { %1206 = vmatpush1.msra.mxu1 %v983_v24 }
 0x23f   : > { %v964_v33 = vpop.permute.xlu0 %963 }
 0x240   : > { %v993_v35 = vpop.permute.xlu1 %992  ;;  %v1285_v37 = vld [vmem:[#allocation3 + $0x1a8] sm:$0xff] }
 0x241   : > { %v994_v38 = vsel %vm982_vm6, %v991_v25, %v993_v35  ;;  %998 = vst.msk [vmem:[#allocation3 + $0x198] sm:$0xff] %vm443_vm14, %v993_v35  ;;  %1315 = vmatprep.subr.mxu0 %v1285_v37  ;;  %v1162_v35 = vld [vmem:[#allocation3 + $0x8] sm:$0xff] }
 0x242   : > { %1316 = vmatpush1.msra.mxu0 %v1021_v28 }
 0x243   : > { %v898_v39 = vpop.permute.xlu0 %897 }
 0x244   : > { %v927_v0 = vpop.permute.xlu1 %926  ;;  %v1178_v40 = vld [vmem:[#allocation3 + $0x88] sm:$0xff] }
 0x245   : > { %v929_v41 = vsel %vm928_vm8, %v925_v29, %v927_v0  ;;  %933 = vst.msk [vmem:[#allocation3 + $0x78] sm:$0xff] %vm443_vm14, %v927_v0  ;;  %1207 = vmatprep.subr.mxu1 %v1178_v40  ;;  %v1265_v0 = vld [vmem:[#allocation3 + $0x108] sm:$0xff] }
 0x246   : > { %1208 = vmatpush1.msra.mxu1 %v956_v32 }
 0x247   : > { %v2022_v42 = vpop.f32.mrf.mxu0  ;;  %v937_v43 = vpop.permute.xlu0 %936 }
 0x248   : > { %v966_v44 = vpop.permute.xlu1 %965  ;;  %v1283_v45 = vld [vmem:[#allocation3 + $0x198] sm:$0xff]  ;;  %v1303_v40 = vrot.slane %v2022_v42, 1 }
 0x249   : > { %v967_v46 = vsel %vm955_vm7, %v964_v33, %v966_v44  ;;  %971 = vst.msk [vmem:[#allocation3 + $0x188] sm:$0xff] %vm443_vm14, %v966_v44  ;;  %v1593_v47 = vpop.f32.mrf.mxu0  ;;  %1317 = vmatprep.subr.mxu0 %v1283_v45  ;;  %v1382_v44 = vlaneseq }
 0x24a   : > { %1318 = vmatpush1.msra.mxu0 %v994_v38 }
 0x24b   : > { %v871_v48 = vpop.permute.xlu0 %870  ;;  %v1383_v45 = vshrl.u32 %v1382_v44, 7 }
 0x24c   : > { %v900_v49 = vpop.permute.xlu1 %899  ;;  %v1176_v50 = vld [vmem:[#allocation3 + $0x78] sm:$0xff] }
 0x24d   : > { %v902_v51 = vsel %vm901_vm9, %v898_v39, %v900_v49  ;;  %906 = vst.msk [vmem:[#allocation3 + $0x68] sm:$0xff] %vm443_vm14, %v900_v49  ;;  %1209 = vmatprep.subr.mxu1 %v1176_v50 }
 0x24e   : > { %1210 = vmatpush1.msra.mxu1 %v929_v41  ;;  %v1663_v41 = vmov 1966171168  }
 0x24f   : > { %v910_v52 = vpop.permute.xlu0 %909 }
 0x250   : > { %v939_v53 = vpop.permute.xlu1 %938  ;;  %v1281_v54 = vld [vmem:[#allocation3 + $0x188] sm:$0xff] }
 0x251   : > { %v940_v55 = vsel %vm928_vm8, %v937_v43, %v939_v53  ;;  %944 = vst.msk [vmem:[#allocation3 + $0x178] sm:$0xff] %vm443_vm14, %v939_v53  ;;  %1319 = vmatprep.subr.mxu0 %v1281_v54  ;;  %v1380_v43 = vunpack.c.l.s4 %v1663_v41 }
 0x252   : > { %1320 = vmatpush1.msra.mxu0 %v967_v46 }
 0x253   : > { %v844_v56 = vpop.permute.xlu0 %843 }
 0x254   : > { %v873_v57 = vpop.permute.xlu1 %872  ;;  %v1174_v58 = vld [vmem:[#allocation3 + $0x68] sm:$0xff] }
 0x255   : > { %v875_v59 = vsel %vm874_vm10, %v871_v48, %v873_v57  ;;  %879 = vst.msk [vmem:[#allocation3 + $0x58] sm:$0xff] %vm443_vm14, %v873_v57  ;;  %1211 = vmatprep.subr.mxu1 %v1174_v58 }
 0x256   : > { %1212 = vmatpush1.msra.mxu1 %v902_v51 }
 0x257   : > { %v883_v60 = vpop.permute.xlu0 %882 }
 0x258   : > { %v912_v61 = vpop.permute.xlu1 %911  ;;  %v1279_v62 = vld [vmem:[#allocation3 + $0x178] sm:$0xff] }
 0x259   : > { %v913_v63 = vsel %vm901_vm9, %v910_v52, %v912_v61  ;;  %917 = vst.msk [vmem:[#allocation3 + $0x168] sm:$0xff] %vm443_vm14, %v912_v61  ;;  %1321 = vmatprep.subr.mxu0 %v1279_v62 }
 0x25a   : > { %1322 = vmatpush1.msra.mxu0 %v940_v55 }
 0x25b   : > { %v817_v1 = vpop.permute.xlu0 %816 }
 0x25c   : > { %v846_v2 = vpop.permute.xlu1 %845  ;;  %v1172_v3 = vld [vmem:[#allocation3 + $0x58] sm:$0xff] }
 0x25d   : > { %v848_v4 = vsel %vm847_vm11, %v844_v56, %v846_v2  ;;  %852 = vst.msk [vmem:[#allocation3 + $0x48] sm:$0xff] %vm443_vm14, %v846_v2  ;;  %1213 = vmatprep.subr.mxu1 %v1172_v3 }
 0x25e   : > { %1214 = vmatpush1.msra.mxu1 %v875_v59 }
 0x25f   : > { %v856_v5 = vpop.permute.xlu0 %855 }
 0x260   : > { %v885_v6 = vpop.permute.xlu1 %884  ;;  %v1277_v7 = vld [vmem:[#allocation3 + $0x168] sm:$0xff] }
 0x261   : > { %v886_v8 = vsel %vm874_vm10, %v883_v60, %v885_v6  ;;  %890 = vst.msk [vmem:[#allocation3 + $0x158] sm:$0xff] %vm443_vm14, %v885_v6  ;;  %1323 = vmatprep.subr.mxu0 %v1277_v7 }
 0x262   : > { %1324 = vmatpush1.msra.mxu0 %v913_v63 }
 0x263   : > { %v790_v11 = vpop.permute.xlu0 %789 }
 0x264   : > { %v819_v9 = vpop.permute.xlu1 %818  ;;  %v1170_v10 = vld [vmem:[#allocation3 + $0x48] sm:$0xff] }
 0x265   : > { %v821_v12 = vsel %vm820_vm12, %v817_v1, %v819_v9  ;;  %825 = vst.msk [vmem:[#allocation3 + $0x38] sm:$0xff] %vm443_vm14, %v819_v9  ;;  %1215 = vmatprep.subr.mxu1 %v1170_v10 }
 0x266   : > { %1216 = vmatpush1.msra.mxu1 %v848_v4 }
 0x267   : > { %v829_v16 = vpop.permute.xlu0 %828 }
 0x268   : > { %v858_v13 = vpop.permute.xlu1 %857  ;;  %v1275_v14 = vld [vmem:[#allocation3 + $0x158] sm:$0xff] }
 0x269   : > { %v859_v15 = vsel %vm847_vm11, %v856_v5, %v858_v13  ;;  %863 = vst.msk [vmem:[#allocation3 + $0x148] sm:$0xff] %vm443_vm14, %v858_v13  ;;  %1325 = vmatprep.subr.mxu0 %v1275_v14 }
 0x26a   : > { %1326 = vmatpush1.msra.mxu0 %v886_v8 }
 0x26b   : > { %v763_v22 = vpop.permute.xlu0 %762 }
 0x26c   : > { %v792_v17 = vpop.permute.xlu1 %791  ;;  %v1168_v18 = vld [vmem:[#allocation3 + $0x38] sm:$0xff] }
 0x26d   : > { %v794_v19 = vsel %vm793_vm13, %v790_v11, %v792_v17  ;;  %798 = vst.msk [vmem:[#allocation3 + $0x28] sm:$0xff] %vm443_vm14, %v792_v17  ;;  %1217 = vmatprep.subr.mxu1 %v1168_v18 }
 0x26e   : > { %1218 = vmatpush1.msra.mxu1 %v821_v12 }
 0x26f   : > { %v802_v27 = vpop.permute.xlu0 %801 }
 0x270   : > { %v831_v20 = vpop.permute.xlu1 %830  ;;  %v1273_v21 = vld [vmem:[#allocation3 + $0x148] sm:$0xff] }
 0x271   : > { %v832_v23 = vsel %vm820_vm12, %v829_v16, %v831_v20  ;;  %836 = vst.msk [vmem:[#allocation3 + $0x138] sm:$0xff] %vm443_vm14, %v831_v20  ;;  %1327 = vmatprep.subr.mxu0 %v1273_v21 }
 0x272   : > { %1328 = vmatpush1.msra.mxu0 %v859_v15 }
 0x273   : > { %v775_v31 = vpop.permute.xlu0 %774 }
 0x274   : > { %v765_v24 = vpop.permute.xlu1 %764  ;;  %v1166_v25 = vld [vmem:[#allocation3 + $0x28] sm:$0xff] }
 0x275   : > { %v767_v26 = vsel %vm766_vm15, %v763_v22, %v765_v24  ;;  %771 = vst.msk [vmem:[#allocation3 + $0x18] sm:$0xff] %vm443_vm14, %v765_v24  ;;  %1219 = vmatprep.subr.mxu1 %v1166_v25 }
 0x276   : > { %1220 = vmatpush1.msra.mxu1 %v794_v19 }
 0x278   : > { %v804_v28 = vpop.permute.xlu1 %803  ;;  %v1271_v29 = vld [vmem:[#allocation3 + $0x138] sm:$0xff] }
 0x279   : > { %v805_v30 = vsel %vm793_vm13, %v802_v27, %v804_v28  ;;  %809 = vst.msk [vmem:[#allocation3 + $0x128] sm:$0xff] %vm443_vm14, %v804_v28  ;;  %1329 = vmatprep.subr.mxu0 %v1271_v29 }
 0x27a   : > { %1330 = vmatpush1.msra.mxu0 %v832_v23 }
 0x27c   : > { %v777_v32 = vpop.permute.xlu1 %776  ;;  %v1164_v33 = vld [vmem:[#allocation3 + $0x18] sm:$0xff] }
 0x27d   : > { %v778_v37 = vsel %vm766_vm15, %v775_v31, %v777_v32  ;;  %782 = vst.msk [vmem:[#allocation3 + $0x118] sm:$0xff] %vm443_vm14, %v777_v32  ;;  %1221 = vmatprep.subr.mxu1 %v1164_v33  ;;  %vm1396_vm14 = vcmp.lt.s32.totalorder %v1382_v44, 196 }
 0x27e   : > { %1222 = vmatpush1.msra.mxu1 %v767_v26 }
 0x27f   : > { %1223 = vmatprep.subr.mxu1 %v1162_v35 }
 0x280   : > { %1224 = vmatpush1.msra.mxu1 %v1910_v36  ;;  %v1269_v38 = vld [vmem:[#allocation3 + $0x128] sm:$0xff]  ;;  %v1381_v36 = vunpack.c.0.s8 %v1380_v43  ;;  %v1300_v51 = vpop.permute.xlu0 %1299 }
 0x281   : > { %1258 = vmatmul.mubr.f32.vlgmr.msra.gmra.mxu1 %v2022_v42  ;;  %1331 = vmatprep.subr.mxu0 %v1269_v38 }
 0x282   : > { %1332 = vmatpush1.msra.mxu0 %v805_v30  ;;  %v1384_v47 = vsub.s32 %v1381_v36, %v1383_v45 }
 0x284   : > { %v1267_v39 = vld [vmem:[#allocation3 + $0x118] sm:$0xff] }
 0x285   : > { %1333 = vmatprep.subr.mxu0 %v1267_v39 }
 0x286   : > { %1334 = vmatpush1.msra.mxu0 %v778_v37 }
 0x287   : > { %1335 = vmatprep.subr.mxu0 %v1265_v0 }
 0x288   : > { %1336 = vmatpush1.msra.mxu0 %v1906_v34 }
 0x289   : > { %1370 = vmatmul.mubr.f32.vlgmr.msra.gmra.mxu0 %v1303_v40 }
 0x341   : > { %v1259_v46 = vpop.f32.mrf.mxu1 }
 0x343   : > { %v1261_v48 = vpop.f32.mrf.mxu1 }
 0x344   : > { %v1378_v49 = vcombine.low %v1259_v46, %v1261_v48 }
 0x346   : > { %v1385_v50 = vrot.slane %v1378_v49, %v1384_v47 }
 0x348   : > { %v1392_v42 = vrot.slane %v1385_v50, %v1384_v47 }
 0x349   : > { %v1371_v34 = vpop.f32.mrf.mxu0 }
 0x34a   : > { %v1372_v52 = vadd.f32 %v1371_v34, %v1300_v51  ;;  %1398 = vst.msk [vmem:[%s325_s21] ss:$8 sm:$0x3] %vm1396_vm14, %v1392_v42 }
 0x34b   : > { %v1373_v53 = vpop.f32.mrf.mxu0 }
 0x34c   : > { %v1402_v54 = vrot.slane %v1372_v52, 7  ;;  %v1374_v55 = vadd.f32 %v1373_v53, %v1300_v51 }
 0x34e   : > { %1406 = vst [vmem:[%s325_s21] sm:$0x1e] %v1402_v54  ;;  %v1403_v56 = vrot.slane %v1374_v55, 7 }
 0x350   : > { %1408 = vst.msk [vmem:[%s325_s21 + $0x8] sm:$0x1e] %vm1407_vm0, %v1403_v56 }
 0x351 PF: > { %s18_s27 = sadd.s32 1, %s1637_s27  }
 0x352   : > { %p15_p4 = scmp.ge.s32.totalorder %s18_s27, 4  }
 0x354   :  { %17 = sbr.rel (!%p15_p4) target bundleno = 1 (0x1), region = 85 }

</bundles_post_ra>
